<compile_context>
chip_gen: v6e
topology: v6e:2x2x1
jax: 0.10.0
libtpu: 0.0.40
codegen_flags: <defaults>
</compile_context>

<pallas_src>
import functools

import jax
import jax.numpy as jnp
from jax.experimental import pallas as pl
from jax.experimental.pallas import tpu as pltpu


def _round_up(x, m):
    return ((x + m - 1) // m) * m


def _vmem_cap_bytes():
    """Physical per-core VMEM; fallback 64 MiB (smallest across v5e/v6e/v7x)."""
    try:
        cap = getattr(pltpu.get_tpu_info(), "vmem_capacity_bytes", None)
        if cap:
            return int(cap)
    except Exception:
        pass
    return 64 * 1024 * 1024


def _autoencoder_kernel(x_ref,
                        w1_ref, b1_ref, w2_ref, b2_ref,
                        w3_ref, b3_ref, w4_ref, b4_ref,
                        z_ref, xr_ref):
    # Compute dtype comes from the (wrapper-cast) weights; x arrives in its
    # original dtype and is cast in-kernel (VPU filler under MXU/DMA slack).
    cdt = w1_ref.dtype
    x = x_ref[...].astype(cdt)                                # (tile, in)

    # Encoder: Linear -> ReLU -> Linear  (MXU dots, f32 accumulation).
    h = jnp.dot(x, w1_ref[...], preferred_element_type=jnp.float32) + b1_ref[...]
    h = jnp.maximum(h, 0.0).astype(cdt)
    z = jnp.dot(h, w2_ref[...], preferred_element_type=jnp.float32) + b2_ref[...]

    # Decoder: Linear -> ReLU -> Linear.
    g = jnp.dot(z.astype(cdt), w3_ref[...],
                preferred_element_type=jnp.float32) + b3_ref[...]
    g = jnp.maximum(g, 0.0).astype(cdt)
    xr = jnp.dot(g, w4_ref[...], preferred_element_type=jnp.float32) + b4_ref[...]

    z_ref[...] = z.astype(z_ref.dtype)
    xr_ref[...] = xr.astype(xr_ref.dtype)


@functools.partial(jax.jit, static_argnames=("batch_tile", "compute_dtype"))
def autoencoder_forward(x, params, *, batch_tile=256, compute_dtype=jnp.bfloat16):
    """x: (N, input_dim) float32. params: dict of w1,b1,w2,b2,w3,b3,w4,b4.

    Weights are (in_features, out_features) (transpose of nn.Linear.weight),
    biases are (1, out_features). Returns (z, x_recon) in float32.
    """
    n, input_dim = x.shape
    hidden_dim = params["w1"].shape[1]
    latent_dim = params["w2"].shape[1]

    # Batch tile: multiple of 8, no larger than the (rounded-up) batch.
    tile = max(8, min(_round_up(batch_tile, 8), _round_up(n, 8)))
    grid = (pl.cdiv(n, tile),)          # ragged last block handled by Pallas

    # One-time (tiny) weight cast to the matmul dtype; biases stay f32.
    cdt = compute_dtype
    w1 = params["w1"].astype(cdt)
    b1 = params["b1"].astype(jnp.float32)
    w2 = params["w2"].astype(cdt)
    b2 = params["b2"].astype(jnp.float32)
    w3 = params["w3"].astype(cdt)
    b3 = params["b3"].astype(jnp.float32)
    w4 = params["w4"].astype(cdt)
    b4 = params["b4"].astype(jnp.float32)

    # VMEM budget: 2x double-buffered per-step tiles (x in, z/xr out),
    # 2x weights (constant-index inputs are still double-buffered by default),
    # biases, f32 intermediates + in-kernel casts, +20% headroom.
    cb = jnp.dtype(cdt).itemsize
    x_bytes = jnp.dtype(x.dtype).itemsize
    tile_b = 2 * tile * (input_dim * x_bytes + (latent_dim + input_dim) * 4)
    w_b = 2 * (input_dim * hidden_dim + hidden_dim * latent_dim +
               latent_dim * hidden_dim + hidden_dim * input_dim) * cb
    bias_b = 2 * (2 * hidden_dim + latent_dim + input_dim) * 4
    interm_b = tile * (2 * hidden_dim + latent_dim + 2 * input_dim) * (4 + cb)
    est = int(1.2 * (tile_b + w_b + bias_b + interm_b))
    cap = int(0.8 * _vmem_cap_bytes())   # ~51 MiB on v7x, ~102 MiB on v5e/v6e
    vmem_limit = int(min(max(est, 16 * 1024 * 1024), cap))

    def row_spec(d):
        # block == (tile, full feature dim): satisfies the (8,128) rule.
        return pl.BlockSpec((tile, d), lambda i: (i, 0))

    def full_spec(shape):
        # resident across the whole grid (constant index_map).
        return pl.BlockSpec(shape, lambda i: (0, 0))

    z, x_recon = pl.pallas_call(
        _autoencoder_kernel,
        out_shape=(
            jax.ShapeDtypeStruct((n, latent_dim), jnp.float32),
            jax.ShapeDtypeStruct((n, input_dim), jnp.float32),
        ),
        grid_spec=pl.GridSpec(
            grid=grid,
            in_specs=[
                row_spec(input_dim),                       # x tile (f32)
                full_spec(w1.shape), full_spec(b1.shape),
                full_spec(w2.shape), full_spec(b2.shape),
                full_spec(w3.shape), full_spec(b3.shape),
                full_spec(w4.shape), full_spec(b4.shape),
            ],
            out_specs=[
                row_spec(latent_dim),    # z (unpadded)
                row_spec(input_dim),     # x_recon (unpadded)
            ],
        ),
        compiler_params=pltpu.CompilerParams(
            dimension_semantics=("parallel",),
            vmem_limit_bytes=vmem_limit,
        ),
    )(x, w1, b1, w2, b2, w3, b3, w4, b4)

    return z, x_recon


def init_params(key, input_dim, hidden_dim, latent_dim):
    """Deterministic synthetic init (PyTorch-like uniform fan-in scaling)."""
    keys = jax.random.split(key, 8)

    def linear(kw, kb, fan_in, fan_out):
        bound = 1.0 / jnp.sqrt(fan_in)
        w = jax.random.uniform(kw, (fan_in, fan_out), jnp.float32, -bound, bound)
        b = jax.random.uniform(kb, (1, fan_out), jnp.float32, -bound, bound)
        return w, b

    w1, b1 = linear(keys[0], keys[1], input_dim, hidden_dim)
    w2, b2 = linear(keys[2], keys[3], hidden_dim, latent_dim)
    w3, b3 = linear(keys[4], keys[5], latent_dim, hidden_dim)
    w4, b4 = linear(keys[6], keys[7], hidden_dim, input_dim)
    return dict(w1=w1, b1=b1, w2=w2, b2=b2, w3=w3, b3=b3, w4=w4, b4=b4)


def reference_forward(x, p):
    h = jnp.maximum(x @ p["w1"] + p["b1"], 0.0)
    z = h @ p["w2"] + p["b2"]
    g = jnp.maximum(z @ p["w3"] + p["b3"], 0.0)
    xr = g @ p["w4"] + p["b4"]
    return z, xr


if __name__ == "__main__":
    key = jax.random.PRNGKey(0)
    k_x, k_p = jax.random.split(key)

    # Small shapes consistent with the module; batch is NOT a multiple of the
    # tile (exercises the ragged last grid block) and gives a 2-step grid.
    batch = 300
    input_dim, hidden_dim, latent_dim = 32, 64, 16

    x = jax.random.normal(k_x, (batch, input_dim), jnp.float32)
    params = init_params(k_p, input_dim, hidden_dim, latent_dim)

    z_ref, xr_ref = reference_forward(x, params)

    # Fast path: bf16 MXU inputs, f32 accumulation.
    z, x_recon = autoencoder_forward(x, params, batch_tile=256,
                                     compute_dtype=jnp.bfloat16)
    jax.block_until_ready((z, x_recon))
    assert z.shape == (batch, latent_dim) and x_recon.shape == (batch, input_dim)
    assert jnp.allclose(z, z_ref, atol=1e-1, rtol=1e-1)
    assert jnp.allclose(x_recon, xr_ref, atol=1e-1, rtol=1e-1)

    # Full-precision path for tight validation.
    z32, xr32 = autoencoder_forward(x, params, batch_tile=256,
                                    compute_dtype=jnp.float32)
    jax.block_until_ready((z32, xr32))
    assert jnp.allclose(z32, z_ref, atol=1e-5, rtol=1e-5)
    assert jnp.allclose(xr32, xr_ref, atol=1e-5, rtol=1e-5)

    print("KERNEL_OK")
</pallas_src>

<mosaic_0001>
module attributes {stable_mosaic.version = 11 : i64} {
  func.func @_autoencoder_kernel(%arg0: i32, %arg1: memref<256x32xf32, #tpu.memory_space<vmem>>, %arg2: memref<32x64xbf16, #tpu.memory_space<vmem>>, %arg3: memref<1x64xf32, #tpu.memory_space<vmem>>, %arg4: memref<64x16xbf16, #tpu.memory_space<vmem>>, %arg5: memref<1x16xf32, #tpu.memory_space<vmem>>, %arg6: memref<16x64xbf16, #tpu.memory_space<vmem>>, %arg7: memref<1x64xf32, #tpu.memory_space<vmem>>, %arg8: memref<64x32xbf16, #tpu.memory_space<vmem>>, %arg9: memref<1x32xf32, #tpu.memory_space<vmem>>, %arg10: memref<256x16xf32, #tpu.memory_space<vmem>>, %arg11: memref<256x32xf32, #tpu.memory_space<vmem>>) attributes {dimension_semantics = [#tpu.dimension_semantics<parallel>], iteration_bounds = array<i64: 2>, scalar_prefetch = 0 : i64, scratch_operands = 0 : i64, tpu.core_type = #tpu.core_type<tc>, window_params = [{transform_indices = @transform_0, window_bounds = array<i64: 256, 32>}, {pipeline_mode = #tpu.pipeline_mode<synchronous>, transform_indices = @transform_1, window_bounds = array<i64: 32, 64>}, {pipeline_mode = #tpu.pipeline_mode<synchronous>, transform_indices = @transform_2, window_bounds = array<i64: 1, 64>}, {pipeline_mode = #tpu.pipeline_mode<synchronous>, transform_indices = @transform_3, window_bounds = array<i64: 64, 16>}, {pipeline_mode = #tpu.pipeline_mode<synchronous>, transform_indices = @transform_4, window_bounds = array<i64: 1, 16>}, {pipeline_mode = #tpu.pipeline_mode<synchronous>, transform_indices = @transform_5, window_bounds = array<i64: 16, 64>}, {pipeline_mode = #tpu.pipeline_mode<synchronous>, transform_indices = @transform_6, window_bounds = array<i64: 1, 64>}, {pipeline_mode = #tpu.pipeline_mode<synchronous>, transform_indices = @transform_7, window_bounds = array<i64: 64, 32>}, {pipeline_mode = #tpu.pipeline_mode<synchronous>, transform_indices = @transform_8, window_bounds = array<i64: 1, 32>}, {transform_indices = @transform_9, window_bounds = array<i64: 256, 16>}, {transform_indices = @transform_10, window_bounds = array<i64: 256, 32>}]} {
    %c0 = arith.constant 0 : index
    %c0_0 = arith.constant 0 : index
    %0 = vector.load %arg1[%c0, %c0_0] : memref<256x32xf32, #tpu.memory_space<vmem>>, vector<256x32xf32>
    %1 = arith.truncf %0 : vector<256x32xf32> to vector<256x32xbf16>
    %c0_1 = arith.constant 0 : index
    %c0_2 = arith.constant 0 : index
    %2 = vector.load %arg2[%c0_1, %c0_2] : memref<32x64xbf16, #tpu.memory_space<vmem>>, vector<32x64xbf16>
    %cst = arith.constant dense<0.000000e+00> : vector<256x64xf32>
    %3 = tpu.matmul %1, %2, %cst {dimension_numbers = #tpu.dot_dimension_numbers<[1], [0], [0], [1], [0, 0, 1, 1], [], []>} : vector<256x32xbf16>, vector<32x64xbf16>, vector<256x64xf32> -> vector<256x64xf32>
    %c0_3 = arith.constant 0 : index
    %c0_4 = arith.constant 0 : index
    %4 = vector.load %arg3[%c0_3, %c0_4] : memref<1x64xf32, #tpu.memory_space<vmem>>, vector<1x64xf32>
    %5 = vector.broadcast %4 : vector<1x64xf32> to vector<256x64xf32>
    %6 = arith.addf %3, %5 : vector<256x64xf32>
    %cst_5 = arith.constant 0.000000e+00 : f32
    %7 = vector.broadcast %cst_5 : f32 to vector<256x64xf32>
    %8 = arith.maximumf %6, %7 : vector<256x64xf32>
    %9 = arith.truncf %8 : vector<256x64xf32> to vector<256x64xbf16>
    %c0_6 = arith.constant 0 : index
    %c0_7 = arith.constant 0 : index
    %10 = vector.load %arg4[%c0_6, %c0_7] : memref<64x16xbf16, #tpu.memory_space<vmem>>, vector<64x16xbf16>
    %cst_8 = arith.constant dense<0.000000e+00> : vector<256x16xf32>
    %11 = tpu.matmul %9, %10, %cst_8 {dimension_numbers = #tpu.dot_dimension_numbers<[1], [0], [0], [1], [0, 0, 1, 1], [], []>} : vector<256x64xbf16>, vector<64x16xbf16>, vector<256x16xf32> -> vector<256x16xf32>
    %c0_9 = arith.constant 0 : index
    %c0_10 = arith.constant 0 : index
    %12 = vector.load %arg5[%c0_9, %c0_10] : memref<1x16xf32, #tpu.memory_space<vmem>>, vector<1x16xf32>
    %13 = vector.broadcast %12 : vector<1x16xf32> to vector<256x16xf32>
    %14 = arith.addf %11, %13 : vector<256x16xf32>
    %15 = arith.truncf %14 : vector<256x16xf32> to vector<256x16xbf16>
    %c0_11 = arith.constant 0 : index
    %c0_12 = arith.constant 0 : index
    %16 = vector.load %arg6[%c0_11, %c0_12] : memref<16x64xbf16, #tpu.memory_space<vmem>>, vector<16x64xbf16>
    %cst_13 = arith.constant dense<0.000000e+00> : vector<256x64xf32>
    %17 = tpu.matmul %15, %16, %cst_13 {dimension_numbers = #tpu.dot_dimension_numbers<[1], [0], [0], [1], [0, 0, 1, 1], [], []>} : vector<256x16xbf16>, vector<16x64xbf16>, vector<256x64xf32> -> vector<256x64xf32>
    %c0_14 = arith.constant 0 : index
    %c0_15 = arith.constant 0 : index
    %18 = vector.load %arg7[%c0_14, %c0_15] : memref<1x64xf32, #tpu.memory_space<vmem>>, vector<1x64xf32>
    %19 = vector.broadcast %18 : vector<1x64xf32> to vector<256x64xf32>
    %20 = arith.addf %17, %19 : vector<256x64xf32>
    %cst_16 = arith.constant 0.000000e+00 : f32
    %21 = vector.broadcast %cst_16 : f32 to vector<256x64xf32>
    %22 = arith.maximumf %20, %21 : vector<256x64xf32>
    %23 = arith.truncf %22 : vector<256x64xf32> to vector<256x64xbf16>
    %c0_17 = arith.constant 0 : index
    %c0_18 = arith.constant 0 : index
    %24 = vector.load %arg8[%c0_17, %c0_18] : memref<64x32xbf16, #tpu.memory_space<vmem>>, vector<64x32xbf16>
    %cst_19 = arith.constant dense<0.000000e+00> : vector<256x32xf32>
    %25 = tpu.matmul %23, %24, %cst_19 {dimension_numbers = #tpu.dot_dimension_numbers<[1], [0], [0], [1], [0, 0, 1, 1], [], []>} : vector<256x64xbf16>, vector<64x32xbf16>, vector<256x32xf32> -> vector<256x32xf32>
    %c0_20 = arith.constant 0 : index
    %c0_21 = arith.constant 0 : index
    %26 = vector.load %arg9[%c0_20, %c0_21] : memref<1x32xf32, #tpu.memory_space<vmem>>, vector<1x32xf32>
    %27 = vector.broadcast %26 : vector<1x32xf32> to vector<256x32xf32>
    %28 = arith.addf %25, %27 : vector<256x32xf32>
    %c0_22 = arith.constant 0 : index
    %c0_23 = arith.constant 0 : index
    %29 = vector.load %arg10[%c0_22, %c0_23] : memref<256x16xf32, #tpu.memory_space<vmem>>, vector<256x16xf32>
    tpu.vector_store %arg10[%c0_22, %c0_23], %14 {strides = array<i32>} : memref<256x16xf32, #tpu.memory_space<vmem>>, vector<256x16xf32>,
    %c0_24 = arith.constant 0 : index
    %c0_25 = arith.constant 0 : index
    %30 = vector.load %arg11[%c0_24, %c0_25] : memref<256x32xf32, #tpu.memory_space<vmem>>, vector<256x32xf32>
    tpu.vector_store %arg11[%c0_24, %c0_25], %28 {strides = array<i32>} : memref<256x32xf32, #tpu.memory_space<vmem>>, vector<256x32xf32>,
    return
  }
  func.func @transform_0(%arg0: i32) -> (i32, i32) {
    %c0_i32 = arith.constant 0 : i32
    %c0_i32_0 = arith.constant 0 : i32
    return %arg0, %c0_i32 : i32, i32
  }
  func.func @transform_1(%arg0: i32) -> (i32, i32) {
    %c0_i32 = arith.constant 0 : i32
    %c0_i32_0 = arith.constant 0 : i32
    %c0_i32_1 = arith.constant 0 : i32
    return %c0_i32, %c0_i32_0 : i32, i32
  }
  func.func @transform_2(%arg0: i32) -> (i32, i32) {
    %c0_i32 = arith.constant 0 : i32
    %c0_i32_0 = arith.constant 0 : i32
    %c0_i32_1 = arith.constant 0 : i32
    return %c0_i32, %c0_i32_0 : i32, i32
  }
  func.func @transform_3(%arg0: i32) -> (i32, i32) {
    %c0_i32 = arith.constant 0 : i32
    %c0_i32_0 = arith.constant 0 : i32
    %c0_i32_1 = arith.constant 0 : i32
    return %c0_i32, %c0_i32_0 : i32, i32
  }
  func.func @transform_4(%arg0: i32) -> (i32, i32) {
    %c0_i32 = arith.constant 0 : i32
    %c0_i32_0 = arith.constant 0 : i32
    %c0_i32_1 = arith.constant 0 : i32
    return %c0_i32, %c0_i32_0 : i32, i32
  }
  func.func @transform_5(%arg0: i32) -> (i32, i32) {
    %c0_i32 = arith.constant 0 : i32
    %c0_i32_0 = arith.constant 0 : i32
    %c0_i32_1 = arith.constant 0 : i32
    return %c0_i32, %c0_i32_0 : i32, i32
  }
  func.func @transform_6(%arg0: i32) -> (i32, i32) {
    %c0_i32 = arith.constant 0 : i32
    %c0_i32_0 = arith.constant 0 : i32
    %c0_i32_1 = arith.constant 0 : i32
    return %c0_i32, %c0_i32_0 : i32, i32
  }
  func.func @transform_7(%arg0: i32) -> (i32, i32) {
    %c0_i32 = arith.constant 0 : i32
    %c0_i32_0 = arith.constant 0 : i32
    %c0_i32_1 = arith.constant 0 : i32
    return %c0_i32, %c0_i32_0 : i32, i32
  }
  func.func @transform_8(%arg0: i32) -> (i32, i32) {
    %c0_i32 = arith.constant 0 : i32
    %c0_i32_0 = arith.constant 0 : i32
    %c0_i32_1 = arith.constant 0 : i32
    return %c0_i32, %c0_i32_0 : i32, i32
  }
  func.func @transform_9(%arg0: i32) -> (i32, i32) {
    %c0_i32 = arith.constant 0 : i32
    %c0_i32_0 = arith.constant 0 : i32
    return %arg0, %c0_i32 : i32, i32
  }
  func.func @transform_10(%arg0: i32) -> (i32, i32) {
    %c0_i32 = arith.constant 0 : i32
    %c0_i32_0 = arith.constant 0 : i32
    return %arg0, %c0_i32 : i32, i32
  }
}

</mosaic_0001>

<bundles_post_ra>
// kernel: autoencoder_forward.1
= control target key start
LH: loop header
LB: loop body
LE: loop exit
PB: predicated region body
PF: predicated region fallthrough
CT: control target
= control target key end

     0   :  { %s3671_s0 = inlined_call_operand.vmem [shape: f32[300,32], index: 0, kind: input, shape index: {}]   ;;  %s3672_s1 = inlined_call_operand.vmem [shape: bf16[32,64], index: 1, kind: input, shape index: {}]   ;;  %s3673_s2 = inlined_call_operand.vmem [shape: f32[1,64], index: 2, kind: input, shape index: {}]   ;;  %s3674_s3 = inlined_call_operand.vmem [shape: bf16[64,16], index: 3, kind: input, shape index: {}]   ;;  %s3675_s4 = inlined_call_operand.vmem [shape: f32[1,16], index: 4, kind: input, shape index: {}]   ;;  %s3676_s5 = inlined_call_operand.vmem [shape: bf16[16,64], index: 5, kind: input, shape index: {}]   ;;  %s3677_s6 = inlined_call_operand.vmem [shape: f32[1,64], index: 6, kind: input, shape index: {}]   ;;  %s3678_s7 = inlined_call_operand.vmem [shape: bf16[64,32], index: 7, kind: input, shape index: {}]   ;;  %s3679_s8 = inlined_call_operand.vmem [shape: f32[1,32], index: 8, kind: input, shape index: {}]   ;;  %s3680_s9 = inlined_call_operand.vmem [shape: f32[300,16], index: 9, kind: output, shape index: {0}]   ;;  %s3681_s10 = inlined_call_operand.vmem [shape: f32[300,32], index: 10, kind: output, shape index: {1}]  }
   0x1   :  { %3682 = sst [smem:[#allocation4_spill]] %s3671_s0 }
   0x2   :  { %3683 = sst [smem:[#allocation5_spill]] %s3672_s1 }
   0x3   :  { %3684 = sst [smem:[#allocation6_spill]] %s3673_s2 }
   0x4   :  { %s2950_s13 = smov 0   ;;  %s2952_s14 = smov 0  }
   0x5   :  { %s2954_s15 = smov 0  }
   0x6 LB: > { %s2963_s16 = sadd.s32 4294967295, %s2829_s15   ;;  %s2965_s17 = sadd.s32 1, %s2829_s15   ;;  %s2829_s15 = sphi %s2954_s15, %s3701_s15   ;;  %s2825_s14 = sphi %s2952_s14, %s3700_s14   ;;  %s2821_s13 = sphi %s2950_s13, %s3699_s13  }
   0x7   : > { %s219_s18 = ssub.s32 %s2829_s15, %s2965_s17  ;;  %s222_s19 = sadd.s32 1, %s2825_s14 }
   0x8   : > { %p220_p0 = scmp.eq.s32.totalorder %s219_s18, 0  ;;  %p232_p1 = scmp.ne.s32.totalorder %s2825_s14, %s2821_s13 }
   0x9   : > { %p233_p2 = scmp.eq.s32.totalorder %s2963_s16, 1  ;;  %p2233_p3 = scmp.ge.s32.totalorder %s2829_s15, 1 }
   0xa   : > { %s2973_s20 = scalar_select %p220_p0, %s2825_s14, %s222_s19  }
   0xb   : > { %p2975_p4 = por %p233_p2, %p232_p1  ;;  %p324_p5 = scmp.lt.s32.totalorder %s2829_s15, 3 }
   0xd   : > { %p325_p6 = pnand %p2233_p3, %p324_p5 }
   0xe   : > { %s3686_s1 = sld [smem:[#allocation5_spill]] (!%p325_p6)  ;;  %s2983_s24 = sshll.u32 (!%p325_p6), %s2963_s16, 5 }
   0xf   : > { %328 = sbr.rel (%p325_p6) target bundleno = 1004 (0x3ec), region = 56  ;;  %p374_p7 = scmp.lt.s32.totalorder (!%p325_p6), %s2983_s24, 37 }
  0x10   : > { %s3687_s0 = sld [smem:[#allocation4_spill]] (!%p325_p6)  ;;  %s360_s26 = sand.u32 (!%p325_p6), 1, %s2821_s13  }
  0x11   : > { %s3688_s2 = sld [smem:[#allocation6_spill]] (!%p325_p6)  ;;  %s3124_s27 = sshll.u32 (!%p325_p6), %s360_s26, 8 }
  0x12   : > { %s3306_s18 = scalar_lea.vmem (!%p325_p6), [#allocation3], %s3124_s27  }
  0x14   : > { %v2732_v0 = vld [vmem:[%s3686_s1 + $0x8] sm:$0xff]   ;;  %v2733_v1 = vld [vmem:[%s3686_s1] sm:$0xff]   ;;  %v2734_v2 = vld [vmem:[%s3674_s3 + $0x18] sm:$0xff]   ;;  %s375_s29 = scalar_select %p374_p7, %s2983_s24, 37  ;;  %vm465_vm0 = vcmask 261120   ;;  %vm762_vm1 = vcmask 523264  }
  0x15   : > { %2430 = vmatprep.subr.bf16.mxu0 %v2732_v0  ;;  %2466 = vmatprep.subr.bf16.mxu1 %v2734_v2  ;;  %v2735_v51 = vld [vmem:[%s3674_s3 + $0x10] sm:$0xff]   ;;  %v2736_v52 = vld [vmem:[%s3674_s3 + $0x8] sm:$0xff]   ;;  %v2737_v53 = vld [vmem:[%s3674_s3] sm:$0xff]   ;;  %vm1003_vm2 = vcmask 130048   ;;  %s1585_s19 = ssub.s32 (%p2975_p4), 38, %s2983_s24  ;;  %s2349_s22 = sshll.u32 (%p2975_p4), %s2963_s16, 8 }
  0x16   : > { %2431 = vmatpush3.bf16.msra.mxu0 %v2732_v0  ;;  %s2237_s30 = sshll.u32 %s375_s29, 3  ;;  %2467 = vmatpush3.bf16.msra.mxu1 %v2734_v2  ;;  %v2738_v54 = vld [vmem:[%s3676_s5] sm:$0xff]   ;;  %p1586_p8 = scmp.lt.s32.totalorder (%p2975_p4), %s1585_s19, 32 }
  0x17   : > { %2432 = vmatprep.subr.bf16.mxu0 %v2733_v1  ;;  %s2996_s15 = scalar_lea.vmem %s3687_s0, %s2237_s30  ;;  %2468 = vmatprep.subr.bf16.mxu1 %v2735_v51  ;;  %v3061_v57 = vld [vmem:[%s3688_s2] ss:$0 sm:$0xff]  ;;  %s3133_s30 = scalar_lea.vmem [#allocation2], %s3124_s27  }
  0x18   : > { %v394_v3 = vld [vmem:[%s2996_s15] sm:$0xff]  ;;  %v395_v4 = vld [vmem:[%s2996_s15 + $0x8] sm:$0xff]  ;;  %v396_v5 = vld [vmem:[%s2996_s15 + $0x10] sm:$0xff]  ;;  %s3410_s26 = scalar_lea.vmem (%p2975_p4), %s3680_s9, %s2349_s22  }
  0x19   : > { %v426_v6 = vpack.c.bf16 %v395_v4, %v394_v3  ;;  %v397_v7 = vld [vmem:[%s2996_s15 + $0x18] sm:$0xff]  ;;  %v398_v8 = vld [vmem:[%s2996_s15 + $0x20] sm:$0xff]  ;;  %v399_v9 = vld [vmem:[%s2996_s15 + $0x28] sm:$0xff] }
  0x1a   : > { %2433 = vmatpush3.bf16.msra.mxu0 %v2733_v1  ;;  %v427_v10 = vpack.c.bf16 %v397_v7, %v396_v5  ;;  %v428_v11 = vpack.c.bf16 %v399_v9, %v398_v8  ;;  %v400_v12 = vld [vmem:[%s2996_s15 + $0x30] sm:$0xff]  ;;  %v401_v13 = vld [vmem:[%s2996_s15 + $0x38] sm:$0xff]  ;;  %v402_v14 = vld [vmem:[%s2996_s15 + $0x40] sm:$0xff]  ;;  %2469 = vmatpush3.bf16.msra.mxu1 %v2735_v51 }
  0x1b   : > { %2434 = vmatprep.mubr.msk.bf16.mxu0 %vm465_vm0, %v426_v6  ;;  %v403_v15 = vld [vmem:[%s2996_s15 + $0x48] sm:$0xff]  ;;  %v429_v16 = vpack.c.bf16 %v401_v13, %v400_v12  ;;  %v404_v18 = vld [vmem:[%s2996_s15 + $0x50] sm:$0xff]  ;;  %v405_v19 = vld [vmem:[%s2996_s15 + $0x58] sm:$0xff]  ;;  %2470 = vmatprep.subr.bf16.mxu1 %v2736_v52 }
  0x1c   : > { %v430_v17 = vpack.c.bf16 %v403_v15, %v402_v14  ;;  %v406_v20 = vld [vmem:[%s2996_s15 + $0x60] sm:$0xff]  ;;  %v407_v21 = vld [vmem:[%s2996_s15 + $0x68] sm:$0xff]  ;;  %v431_v22 = vpack.c.bf16 %v405_v19, %v404_v18  ;;  %v408_v24 = vld [vmem:[%s2996_s15 + $0x70] sm:$0xff]  ;;  %2506 = vmatprep.subr.bf16.mxu0 %v2738_v54 }
  0x1d   : > { %2435 = vmatmul.mubr.msk.bf16.vlgmr.msra.gmra.mxu0 %vm465_vm0, %v427_v10  ;;  %v432_v23 = vpack.c.bf16 %v407_v21, %v406_v20  ;;  %v409_v25 = vld [vmem:[%s2996_s15 + $0x78] sm:$0xff]  ;;  %v410_v26 = vld [vmem:[%s2996_s15 + $0x80] sm:$0xff]  ;;  %v411_v27 = vld [vmem:[%s2996_s15 + $0x88] sm:$0xff] }
  0x1e   : > { %2438 = vmatprep.mubr.msk.bf16.mxu0 %vm465_vm0, %v428_v11  ;;  %v433_v28 = vpack.c.bf16 %v409_v25, %v408_v24  ;;  %v434_v29 = vpack.c.bf16 %v411_v27, %v410_v26  ;;  %v412_v30 = vld [vmem:[%s2996_s15 + $0x90] sm:$0xff]  ;;  %v413_v31 = vld [vmem:[%s2996_s15 + $0x98] sm:$0xff]  ;;  %v414_v32 = vld [vmem:[%s2996_s15 + $0xa0] sm:$0xff]  ;;  %2471 = vmatpush3.bf16.msra.mxu1 %v2736_v52 }
  0x1f   : > { %v415_v33 = vld [vmem:[%s2996_s15 + $0xa8] sm:$0xff]  ;;  %v435_v34 = vpack.c.bf16 %v413_v31, %v412_v30  ;;  %v416_v36 = vld [vmem:[%s2996_s15 + $0xb0] sm:$0xff]  ;;  %v417_v37 = vld [vmem:[%s2996_s15 + $0xb8] sm:$0xff]  ;;  %2472 = vmatprep.subr.bf16.mxu1 %v2737_v53  ;;  %2507 = vmatpush3.bf16.msra.mxu0 %v2738_v54 }
  0x20   : > { %v436_v35 = vpack.c.bf16 %v415_v33, %v414_v32  ;;  %v418_v38 = vld [vmem:[%s2996_s15 + $0xc0] sm:$0xff]  ;;  %v419_v39 = vld [vmem:[%s2996_s15 + $0xc8] sm:$0xff]  ;;  %v437_v40 = vpack.c.bf16 %v417_v37, %v416_v36  ;;  %v420_v42 = vld [vmem:[%s2996_s15 + $0xd0] sm:$0xff] }
  0x21   : > { %v438_v41 = vpack.c.bf16 %v419_v39, %v418_v38  ;;  %v421_v43 = vld [vmem:[%s2996_s15 + $0xd8] sm:$0xff]  ;;  %v422_v44 = vld [vmem:[%s2996_s15 + $0xe0] sm:$0xff]  ;;  %v423_v45 = vld [vmem:[%s2996_s15 + $0xe8] sm:$0xff] }
  0x22   : > { %v439_v46 = vpack.c.bf16 %v421_v43, %v420_v42  ;;  %v440_v47 = vpack.c.bf16 %v423_v45, %v422_v44  ;;  %v424_v48 = vld [vmem:[%s2996_s15 + $0xf0] sm:$0xff]  ;;  %v425_v49 = vld [vmem:[%s2996_s15 + $0xf8] sm:$0xff]  ;;  %2473 = vmatpush3.bf16.msra.mxu1 %v2737_v53 }
  0x23   : > { %v441_v50 = vpack.c.bf16 %v425_v49, %v424_v48 }
  0x25   : > { %2439 = vmatmul.mubr.msk.bf16.gmra.mxu0 %vm465_vm0, %v429_v16 }
  0x26   : > { %2442 = vmatprep.mubr.msk.bf16.mxu0 %vm465_vm0, %v430_v17 }
  0x2d   : > { %2443 = vmatmul.mubr.msk.bf16.gmra.mxu0 %vm465_vm0, %v431_v22 }
  0x2e   : > { %2446 = vmatprep.mubr.msk.bf16.mxu0 %vm465_vm0, %v432_v23 }
  0x35   : > { %2447 = vmatmul.mubr.msk.bf16.gmra.mxu0 %vm465_vm0, %v433_v28 }
  0x36   : > { %2450 = vmatprep.mubr.msk.bf16.mxu0 %vm465_vm0, %v434_v29 }
  0x3d   : > { %2451 = vmatmul.mubr.msk.bf16.gmra.mxu0 %vm465_vm0, %v435_v34 }
  0x3e   : > { %2454 = vmatprep.mubr.msk.bf16.mxu0 %vm465_vm0, %v436_v35 }
  0x45   : > { %2455 = vmatmul.mubr.msk.bf16.gmra.mxu0 %vm465_vm0, %v437_v40 }
  0x46   : > { %2458 = vmatprep.mubr.msk.bf16.mxu0 %vm465_vm0, %v438_v41 }
  0x4d   : > { %2459 = vmatmul.mubr.msk.bf16.gmra.mxu0 %vm465_vm0, %v439_v46 }
  0x4e   : > { %2462 = vmatprep.mubr.msk.bf16.mxu0 %vm465_vm0, %v440_v47 }
  0x55   : > { %2463 = vmatmul.mubr.msk.bf16.gmra.mxu0 %vm465_vm0, %v441_v50 }
  0xdd   : > { %v2436_v55 = vpop.f32.mrf.mxu0 }
  0xde   : > { %v557_v61 = vadd.f32 %v2436_v55, %v3061_v57 }
  0xdf   : > { %v548_v56 = vpop.f32.mrf.mxu0 }
  0xe0   : > { %v549_v59 = vadd.f32 %v3061_v57, %v548_v56  ;;  %v677_v4 = vmax.f32 %v557_v61, 0.0 }
  0xe1   : > { %v2437_v58 = vpop.f32.mrf.mxu0 }
  0xe2   : > { %v560_v60 = vadd.f32 %v2437_v58, %v3061_v57  ;;  %v675_v2 = vmax.f32 %v549_v59, 0.0 }
  0xe3   : > { %v551_v62 = vpop.f32.mrf.mxu0 }
  0xe4   : > { %v552_v63 = vadd.f32 %v3061_v57, %v551_v62  ;;  %v678_v0 = vmax.f32 %v560_v60, 0.0 }
  0xe5   : > { %v2440_v1 = vpop.f32.mrf.mxu0 }
  0xe6   : > { %v676_v3 = vmax.f32 %v552_v63, 0.0  ;;  %v708_v7 = vpack.c.bf16 %v678_v0, %v677_v4  ;;  %v573_v11 = vadd.f32 %v2440_v1, %v3061_v57 }
  0xe7   : > { %v564_v5 = vpop.f32.mrf.mxu0 }
  0xe8   : > { %v707_v6 = vpack.c.bf16 %v676_v3, %v675_v2  ;;  %v565_v9 = vadd.f32 %v3061_v57, %v564_v5  ;;  %v681_v18 = vmax.f32 %v573_v11, 0.0 }
  0xe9   : > { %v2441_v8 = vpop.f32.mrf.mxu0 }
  0xea   : > { %v576_v10 = vadd.f32 %v2441_v8, %v3061_v57  ;;  %2474 = vmatprep.mubr.msk.bf16.mxu1 %vm762_vm1, %v707_v6  ;;  %v679_v16 = vmax.f32 %v565_v9, 0.0 }
  0xeb   : > { %v567_v12 = vpop.f32.mrf.mxu0  ;;  %2475 = vmatmul.mubr.msk.bf16.vlgmr.msra.gmra.mxu1 %vm762_vm1, %v708_v7 }
  0xec   : > { %v568_v13 = vadd.f32 %v3061_v57, %v567_v12  ;;  %v682_v14 = vmax.f32 %v576_v10, 0.0 }
  0xed   : > { %v2444_v15 = vpop.f32.mrf.mxu0 }
  0xee   : > { %v680_v17 = vmax.f32 %v568_v13, 0.0  ;;  %v710_v21 = vpack.c.bf16 %v682_v14, %v681_v18  ;;  %v589_v25 = vadd.f32 %v2444_v15, %v3061_v57 }
  0xef   : > { %v580_v19 = vpop.f32.mrf.mxu0 }
  0xf0   : > { %v709_v20 = vpack.c.bf16 %v680_v17, %v679_v16  ;;  %v581_v23 = vadd.f32 %v3061_v57, %v580_v19  ;;  %v685_v32 = vmax.f32 %v589_v25, 0.0 }
  0xf1   : > { %v2445_v22 = vpop.f32.mrf.mxu0 }
  0xf2   : > { %v592_v24 = vadd.f32 %v2445_v22, %v3061_v57  ;;  %2478 = vmatprep.mubr.msk.bf16.mxu1 %vm762_vm1, %v709_v20  ;;  %v683_v30 = vmax.f32 %v581_v23, 0.0 }
  0xf3   : > { %v583_v26 = vpop.f32.mrf.mxu0  ;;  %2479 = vmatmul.mubr.msk.bf16.gmra.mxu1 %vm762_vm1, %v710_v21 }
  0xf4   : > { %v584_v27 = vadd.f32 %v3061_v57, %v583_v26  ;;  %v686_v28 = vmax.f32 %v592_v24, 0.0 }
  0xf5   : > { %v2448_v29 = vpop.f32.mrf.mxu0 }
  0xf6   : > { %v684_v31 = vmax.f32 %v584_v27, 0.0  ;;  %v712_v35 = vpack.c.bf16 %v686_v28, %v685_v32  ;;  %v605_v39 = vadd.f32 %v2448_v29, %v3061_v57 }
  0xf7   : > { %v596_v33 = vpop.f32.mrf.mxu0 }
  0xf8   : > { %v711_v34 = vpack.c.bf16 %v684_v31, %v683_v30  ;;  %v597_v37 = vadd.f32 %v3061_v57, %v596_v33  ;;  %v689_v46 = vmax.f32 %v605_v39, 0.0 }
  0xf9   : > { %v2449_v36 = vpop.f32.mrf.mxu0 }
  0xfa   : > { %v608_v38 = vadd.f32 %v2449_v36, %v3061_v57  ;;  %2482 = vmatprep.mubr.msk.bf16.mxu1 %vm762_vm1, %v711_v34  ;;  %v687_v44 = vmax.f32 %v597_v37, 0.0 }
  0xfb   : > { %v599_v40 = vpop.f32.mrf.mxu0  ;;  %2483 = vmatmul.mubr.msk.bf16.gmra.mxu1 %vm762_vm1, %v712_v35 }
  0xfc   : > { %v600_v41 = vadd.f32 %v3061_v57, %v599_v40  ;;  %v690_v42 = vmax.f32 %v608_v38, 0.0 }
  0xfd   : > { %v2452_v43 = vpop.f32.mrf.mxu0 }
  0xfe   : > { %v688_v45 = vmax.f32 %v600_v41, 0.0  ;;  %v714_v49 = vpack.c.bf16 %v690_v42, %v689_v46  ;;  %v621_v53 = vadd.f32 %v2452_v43, %v3061_v57  ;;  %v2739_v41 = vld [vmem:[%s3678_s7 + $0x18] sm:$0xff]   ;;  %v2740_v42 = vld [vmem:[%s3678_s7 + $0x10] sm:$0xff]   ;;  %v2742_v43 = vld [vmem:[%s3678_s7] sm:$0xff]  }
  0xff   : > { %v612_v47 = vpop.f32.mrf.mxu0  ;;  %2540 = vmatprep.subr.bf16.mxu1 %v2739_v41 }
 0x100   : > { %v713_v48 = vpack.c.bf16 %v688_v45, %v687_v44  ;;  %v613_v51 = vadd.f32 %v3061_v57, %v612_v47  ;;  %v693_v61 = vmax.f32 %v621_v53, 0.0  ;;  %2541 = vmatpush3.bf16.msra.mxu1 %v2739_v41  ;;  %v3129_v44 = vld [vmem:[%s3675_s4] ss:$0 sm:$0xff] }
 0x101   : > { %v2453_v50 = vpop.f32.mrf.mxu0  ;;  %2542 = vmatprep.subr.bf16.mxu1 %v2740_v42 }
 0x102   : > { %v624_v52 = vadd.f32 %v2453_v50, %v3061_v57  ;;  %2486 = vmatprep.mubr.msk.bf16.mxu1 %vm762_vm1, %v713_v48  ;;  %v691_v59 = vmax.f32 %v613_v51, 0.0 }
 0x103   : > { %v615_v54 = vpop.f32.mrf.mxu0  ;;  %2487 = vmatmul.mubr.msk.bf16.gmra.mxu1 %vm762_vm1, %v714_v49 }
 0x104   : > { %v616_v55 = vadd.f32 %v3061_v57, %v615_v54  ;;  %v694_v56 = vmax.f32 %v624_v52, 0.0  ;;  %2543 = vmatpush3.bf16.msra.mxu1 %v2740_v42 }
 0x105   : > { %v2456_v58 = vpop.f32.mrf.mxu0 }
 0x106   : > { %v692_v60 = vmax.f32 %v616_v55, 0.0  ;;  %v716_v0 = vpack.c.bf16 %v694_v56, %v693_v61  ;;  %v637_v4 = vadd.f32 %v2456_v58, %v3061_v57 }
 0x107   : > { %v628_v62 = vpop.f32.mrf.mxu0 }
 0x108   : > { %v715_v63 = vpack.c.bf16 %v692_v60, %v691_v59  ;;  %v629_v2 = vadd.f32 %v3061_v57, %v628_v62  ;;  %v697_v11 = vmax.f32 %v637_v4, 0.0 }
 0x109   : > { %v2457_v1 = vpop.f32.mrf.mxu0 }
 0x10a   : > { %v640_v3 = vadd.f32 %v2457_v1, %v3061_v57  ;;  %2490 = vmatprep.mubr.msk.bf16.mxu1 %vm762_vm1, %v715_v63  ;;  %v695_v9 = vmax.f32 %v629_v2, 0.0 }
 0x10b   : > { %v631_v5 = vpop.f32.mrf.mxu0  ;;  %2491 = vmatmul.mubr.msk.bf16.gmra.mxu1 %vm762_vm1, %v716_v0 }
 0x10c   : > { %v632_v6 = vadd.f32 %v3061_v57, %v631_v5  ;;  %v698_v7 = vmax.f32 %v640_v3, 0.0 }
 0x10d   : > { %v2460_v8 = vpop.f32.mrf.mxu0 }
 0x10e   : > { %v696_v10 = vmax.f32 %v632_v6, 0.0  ;;  %v718_v14 = vpack.c.bf16 %v698_v7, %v697_v11  ;;  %v653_v18 = vadd.f32 %v2460_v8, %v3061_v57 }
 0x10f   : > { %v644_v12 = vpop.f32.mrf.mxu0 }
 0x110   : > { %v717_v13 = vpack.c.bf16 %v696_v10, %v695_v9  ;;  %v645_v16 = vadd.f32 %v3061_v57, %v644_v12  ;;  %v701_v25 = vmax.f32 %v653_v18, 0.0 }
 0x111   : > { %v2461_v15 = vpop.f32.mrf.mxu0 }
 0x112   : > { %v656_v17 = vadd.f32 %v2461_v15, %v3061_v57  ;;  %2494 = vmatprep.mubr.msk.bf16.mxu1 %vm762_vm1, %v717_v13  ;;  %v699_v23 = vmax.f32 %v645_v16, 0.0 }
 0x113   : > { %v647_v19 = vpop.f32.mrf.mxu0  ;;  %2495 = vmatmul.mubr.msk.bf16.gmra.mxu1 %vm762_vm1, %v718_v14 }
 0x114   : > { %v648_v20 = vadd.f32 %v3061_v57, %v647_v19  ;;  %v702_v21 = vmax.f32 %v656_v17, 0.0 }
 0x115   : > { %v2464_v22 = vpop.f32.mrf.mxu0 }
 0x116   : > { %v700_v24 = vmax.f32 %v648_v20, 0.0  ;;  %v720_v28 = vpack.c.bf16 %v702_v21, %v701_v25  ;;  %v669_v32 = vadd.f32 %v2464_v22, %v3061_v57 }
 0x117   : > { %v660_v26 = vpop.f32.mrf.mxu0 }
 0x118   : > { %v719_v27 = vpack.c.bf16 %v700_v24, %v699_v23  ;;  %v661_v30 = vadd.f32 %v3061_v57, %v660_v26  ;;  %v705_v38 = vmax.f32 %v669_v32, 0.0 }
 0x119   : > { %v2465_v29 = vpop.f32.mrf.mxu0 }
 0x11a   : > { %v672_v31 = vadd.f32 %v2465_v29, %v3061_v57  ;;  %2498 = vmatprep.mubr.msk.bf16.mxu1 %vm762_vm1, %v719_v27  ;;  %v703_v36 = vmax.f32 %v661_v30, 0.0 }
 0x11b   : > { %v663_v33 = vpop.f32.mrf.mxu0  ;;  %2499 = vmatmul.mubr.msk.bf16.gmra.mxu1 %vm762_vm1, %v720_v28 }
 0x11c   : > { %v664_v34 = vadd.f32 %v3061_v57, %v663_v33  ;;  %v706_v35 = vmax.f32 %v672_v31, 0.0  ;;  %v2741_v57 = vld [vmem:[%s3678_s7 + $0x8] sm:$0xff]  }
 0x11d   : > { %2544 = vmatprep.subr.bf16.mxu1 %v2741_v57 }
 0x11e   : > { %v704_v37 = vmax.f32 %v664_v34, 0.0  ;;  %v722_v40 = vpack.c.bf16 %v706_v35, %v705_v38  ;;  %2545 = vmatpush3.bf16.msra.mxu1 %v2741_v57 }
 0x11f   : > { %2546 = vmatprep.subr.bf16.mxu1 %v2742_v43 }
 0x120   : > { %v721_v39 = vpack.c.bf16 %v704_v37, %v703_v36 }
 0x122   : > { %2502 = vmatprep.mubr.msk.bf16.mxu1 %vm762_vm1, %v721_v39  ;;  %2547 = vmatpush3.bf16.msra.mxu1 %v2742_v43 }
 0x123   : > { %2503 = vmatmul.mubr.msk.bf16.gmra.mxu1 %vm762_vm1, %v722_v40 }
 0x1ab   : > { %v2476_v45 = vpop.f32.mrf.mxu1 }
 0x1ac   : > { %v854_v46 = vadd.f32 %v2476_v45, %v3129_v44 }
 0x1ad   : > { %v845_v47 = vpop.f32.mrf.mxu1 }
 0x1ae   : > { %1511 = vst.msk [vmem:[%s3133_s30 + $0x10] sm:$0xff] %vm1003_vm2, %v854_v46  ;;  %v846_v48 = vadd.f32 %v3129_v44, %v845_v47 }
 0x1af   : > { %v2477_v49 = vpop.f32.mrf.mxu1 }
 0x1b0   : > { %1509 = vst.msk [vmem:[%s3133_s30] sm:$0xff] %vm1003_vm2, %v846_v48  ;;  %v857_v50 = vadd.f32 %v2477_v49, %v3129_v44 }
 0x1b1   : > { %v848_v51 = vpop.f32.mrf.mxu1 }
 0x1b2   : > { %1512 = vst.msk [vmem:[%s3133_s30 + $0x18] sm:$0xff] %vm1003_vm2, %v857_v50  ;;  %v849_v52 = vadd.f32 %v3129_v44, %v848_v51  ;;  %v973_v56 = vpack.c.bf16 %v857_v50, %v854_v46 }
 0x1b3   : > { %v2480_v53 = vpop.f32.mrf.mxu1 }
 0x1b4   : > { %v972_v54 = vpack.c.bf16 %v849_v52, %v846_v48  ;;  %1510 = vst.msk [vmem:[%s3133_s30 + $0x8] sm:$0xff] %vm1003_vm2, %v849_v52  ;;  %v870_v55 = vadd.f32 %v2480_v53, %v3129_v44 }
 0x1b5   : > { %v861_v58 = vpop.f32.mrf.mxu1 }
 0x1b6   : > { %1515 = vst.msk [vmem:[%s3133_s30 + $0x30] sm:$0xff] %vm1003_vm2, %v870_v55  ;;  %v862_v59 = vadd.f32 %v3129_v44, %v861_v58  ;;  %2508 = vmatprep.mubr.msk.bf16.mxu0 %vm1003_vm2, %v972_v54 }
 0x1b7   : > { %v2481_v60 = vpop.f32.mrf.mxu1  ;;  %2509 = vmatmul.mubr.msk.bf16.vlgmr.msra.gmra.mxu0 %vm1003_vm2, %v973_v56 }
 0x1b8   : > { %1513 = vst.msk [vmem:[%s3133_s30 + $0x20] sm:$0xff] %vm1003_vm2, %v862_v59  ;;  %v873_v61 = vadd.f32 %v2481_v60, %v3129_v44 }
 0x1b9   : > { %v864_v62 = vpop.f32.mrf.mxu1 }
 0x1ba   : > { %1516 = vst.msk [vmem:[%s3133_s30 + $0x38] sm:$0xff] %vm1003_vm2, %v873_v61  ;;  %v865_v63 = vadd.f32 %v3129_v44, %v864_v62  ;;  %v975_v3 = vpack.c.bf16 %v873_v61, %v870_v55 }
 0x1bb   : > { %v2484_v0 = vpop.f32.mrf.mxu1 }
 0x1bc   : > { %v974_v1 = vpack.c.bf16 %v865_v63, %v862_v59  ;;  %1514 = vst.msk [vmem:[%s3133_s30 + $0x28] sm:$0xff] %vm1003_vm2, %v865_v63  ;;  %v886_v2 = vadd.f32 %v2484_v0, %v3129_v44 }
 0x1bd   : > { %v877_v4 = vpop.f32.mrf.mxu1 }
 0x1be   : > { %1519 = vst.msk [vmem:[%s3133_s30 + $0x50] sm:$0xff] %vm1003_vm2, %v886_v2  ;;  %v878_v5 = vadd.f32 %v3129_v44, %v877_v4  ;;  %2512 = vmatprep.mubr.msk.bf16.mxu0 %vm1003_vm2, %v974_v1  ;;  %v3249_v1 = vld [vmem:[%s3677_s6] ss:$0 sm:$0xff] }
 0x1bf   : > { %v2485_v6 = vpop.f32.mrf.mxu1  ;;  %2513 = vmatmul.mubr.msk.bf16.gmra.mxu0 %vm1003_vm2, %v975_v3 }
 0x1c0   : > { %1517 = vst.msk [vmem:[%s3133_s30 + $0x40] sm:$0xff] %vm1003_vm2, %v878_v5  ;;  %v889_v7 = vadd.f32 %v2485_v6, %v3129_v44 }
 0x1c1   : > { %v880_v8 = vpop.f32.mrf.mxu1 }
 0x1c2   : > { %1520 = vst.msk [vmem:[%s3133_s30 + $0x58] sm:$0xff] %vm1003_vm2, %v889_v7  ;;  %v881_v9 = vadd.f32 %v3129_v44, %v880_v8  ;;  %v977_v13 = vpack.c.bf16 %v889_v7, %v886_v2 }
 0x1c3   : > { %v2488_v10 = vpop.f32.mrf.mxu1 }
 0x1c4   : > { %v976_v11 = vpack.c.bf16 %v881_v9, %v878_v5  ;;  %1518 = vst.msk [vmem:[%s3133_s30 + $0x48] sm:$0xff] %vm1003_vm2, %v881_v9  ;;  %v902_v12 = vadd.f32 %v2488_v10, %v3129_v44 }
 0x1c5   : > { %v893_v14 = vpop.f32.mrf.mxu1 }
 0x1c6   : > { %1523 = vst.msk [vmem:[%s3133_s30 + $0x70] sm:$0xff] %vm1003_vm2, %v902_v12  ;;  %v894_v15 = vadd.f32 %v3129_v44, %v893_v14  ;;  %2516 = vmatprep.mubr.msk.bf16.mxu0 %vm1003_vm2, %v976_v11 }
 0x1c7   : > { %v2489_v16 = vpop.f32.mrf.mxu1  ;;  %2517 = vmatmul.mubr.msk.bf16.gmra.mxu0 %vm1003_vm2, %v977_v13 }
 0x1c8   : > { %1521 = vst.msk [vmem:[%s3133_s30 + $0x60] sm:$0xff] %vm1003_vm2, %v894_v15  ;;  %v905_v17 = vadd.f32 %v2489_v16, %v3129_v44 }
 0x1c9   : > { %v896_v18 = vpop.f32.mrf.mxu1 }
 0x1ca   : > { %1524 = vst.msk [vmem:[%s3133_s30 + $0x78] sm:$0xff] %vm1003_vm2, %v905_v17  ;;  %v897_v19 = vadd.f32 %v3129_v44, %v896_v18  ;;  %v979_v23 = vpack.c.bf16 %v905_v17, %v902_v12 }
 0x1cb   : > { %v2492_v20 = vpop.f32.mrf.mxu1 }
 0x1cc   : > { %v978_v21 = vpack.c.bf16 %v897_v19, %v894_v15  ;;  %1522 = vst.msk [vmem:[%s3133_s30 + $0x68] sm:$0xff] %vm1003_vm2, %v897_v19  ;;  %v918_v22 = vadd.f32 %v2492_v20, %v3129_v44 }
 0x1cd   : > { %v909_v24 = vpop.f32.mrf.mxu1 }
 0x1ce   : > { %1527 = vst.msk [vmem:[%s3133_s30 + $0x90] sm:$0xff] %vm1003_vm2, %v918_v22  ;;  %v910_v25 = vadd.f32 %v3129_v44, %v909_v24  ;;  %2520 = vmatprep.mubr.msk.bf16.mxu0 %vm1003_vm2, %v978_v21 }
 0x1cf   : > { %v2493_v26 = vpop.f32.mrf.mxu1  ;;  %2521 = vmatmul.mubr.msk.bf16.gmra.mxu0 %vm1003_vm2, %v979_v23 }
 0x1d0   : > { %1525 = vst.msk [vmem:[%s3133_s30 + $0x80] sm:$0xff] %vm1003_vm2, %v910_v25  ;;  %v921_v27 = vadd.f32 %v2493_v26, %v3129_v44 }
 0x1d1   : > { %v912_v28 = vpop.f32.mrf.mxu1 }
 0x1d2   : > { %1528 = vst.msk [vmem:[%s3133_s30 + $0x98] sm:$0xff] %vm1003_vm2, %v921_v27  ;;  %v913_v29 = vadd.f32 %v3129_v44, %v912_v28  ;;  %v981_v33 = vpack.c.bf16 %v921_v27, %v918_v22 }
 0x1d3   : > { %v2496_v30 = vpop.f32.mrf.mxu1 }
 0x1d4   : > { %v980_v31 = vpack.c.bf16 %v913_v29, %v910_v25  ;;  %1526 = vst.msk [vmem:[%s3133_s30 + $0x88] sm:$0xff] %vm1003_vm2, %v913_v29  ;;  %v934_v32 = vadd.f32 %v2496_v30, %v3129_v44 }
 0x1d5   : > { %v925_v34 = vpop.f32.mrf.mxu1 }
 0x1d6   : > { %1531 = vst.msk [vmem:[%s3133_s30 + $0xb0] sm:$0xff] %vm1003_vm2, %v934_v32  ;;  %v926_v35 = vadd.f32 %v3129_v44, %v925_v34  ;;  %2524 = vmatprep.mubr.msk.bf16.mxu0 %vm1003_vm2, %v980_v31 }
 0x1d7   : > { %v2497_v36 = vpop.f32.mrf.mxu1  ;;  %2525 = vmatmul.mubr.msk.bf16.gmra.mxu0 %vm1003_vm2, %v981_v33 }
 0x1d8   : > { %1529 = vst.msk [vmem:[%s3133_s30 + $0xa0] sm:$0xff] %vm1003_vm2, %v926_v35  ;;  %v937_v37 = vadd.f32 %v2497_v36, %v3129_v44 }
 0x1d9   : > { %v928_v38 = vpop.f32.mrf.mxu1 }
 0x1da   : > { %1532 = vst.msk [vmem:[%s3133_s30 + $0xb8] sm:$0xff] %vm1003_vm2, %v937_v37  ;;  %v929_v39 = vadd.f32 %v3129_v44, %v928_v38  ;;  %v983_v57 = vpack.c.bf16 %v937_v37, %v934_v32 }
 0x1db   : > { %v2500_v40 = vpop.f32.mrf.mxu1 }
 0x1dc   : > { %v982_v41 = vpack.c.bf16 %v929_v39, %v926_v35  ;;  %1530 = vst.msk [vmem:[%s3133_s30 + $0xa8] sm:$0xff] %vm1003_vm2, %v929_v39  ;;  %v950_v42 = vadd.f32 %v2500_v40, %v3129_v44 }
 0x1dd   : > { %v941_v43 = vpop.f32.mrf.mxu1 }
 0x1de   : > { %1535 = vst.msk [vmem:[%s3133_s30 + $0xd0] sm:$0xff] %vm1003_vm2, %v950_v42  ;;  %v942_v45 = vadd.f32 %v3129_v44, %v941_v43  ;;  %2528 = vmatprep.mubr.msk.bf16.mxu0 %vm1003_vm2, %v982_v41 }
 0x1df   : > { %v2501_v46 = vpop.f32.mrf.mxu1  ;;  %2529 = vmatmul.mubr.msk.bf16.gmra.mxu0 %vm1003_vm2, %v983_v57 }
 0x1e0   : > { %1533 = vst.msk [vmem:[%s3133_s30 + $0xc0] sm:$0xff] %vm1003_vm2, %v942_v45  ;;  %v953_v47 = vadd.f32 %v2501_v46, %v3129_v44 }
 0x1e1   : > { %v944_v48 = vpop.f32.mrf.mxu1 }
 0x1e2   : > { %1536 = vst.msk [vmem:[%s3133_s30 + $0xd8] sm:$0xff] %vm1003_vm2, %v953_v47  ;;  %v945_v49 = vadd.f32 %v3129_v44, %v944_v48  ;;  %v985_v53 = vpack.c.bf16 %v953_v47, %v950_v42 }
 0x1e3   : > { %v2504_v50 = vpop.f32.mrf.mxu1 }
 0x1e4   : > { %v984_v51 = vpack.c.bf16 %v945_v49, %v942_v45  ;;  %1534 = vst.msk [vmem:[%s3133_s30 + $0xc8] sm:$0xff] %vm1003_vm2, %v945_v49  ;;  %v966_v52 = vadd.f32 %v2504_v50, %v3129_v44 }
 0x1e5   : > { %v957_v54 = vpop.f32.mrf.mxu1 }
 0x1e6   : > { %1539 = vst.msk [vmem:[%s3133_s30 + $0xf0] sm:$0xff] %vm1003_vm2, %v966_v52  ;;  %v958_v55 = vadd.f32 %v3129_v44, %v957_v54  ;;  %2532 = vmatprep.mubr.msk.bf16.mxu0 %vm1003_vm2, %v984_v51 }
 0x1e7   : > { %v2505_v56 = vpop.f32.mrf.mxu1  ;;  %2533 = vmatmul.mubr.msk.bf16.gmra.mxu0 %vm1003_vm2, %v985_v53 }
 0x1e8   : > { %1537 = vst.msk [vmem:[%s3133_s30 + $0xe0] sm:$0xff] %vm1003_vm2, %v958_v55  ;;  %v969_v58 = vadd.f32 %v2505_v56, %v3129_v44 }
 0x1e9   : > { %v960_v59 = vpop.f32.mrf.mxu1 }
 0x1ea   : > { %1540 = vst.msk [vmem:[%s3133_s30 + $0xf8] sm:$0xff] %vm1003_vm2, %v969_v58  ;;  %v961_v60 = vadd.f32 %v3129_v44, %v960_v59  ;;  %v987_v62 = vpack.c.bf16 %v969_v58, %v966_v52 }
 0x1ec   : > { %v986_v61 = vpack.c.bf16 %v961_v60, %v958_v55  ;;  %1538 = vst.msk [vmem:[%s3133_s30 + $0xe8] sm:$0xff] %vm1003_vm2, %v961_v60 }
 0x1ee   : > { %2536 = vmatprep.mubr.msk.bf16.mxu0 %vm1003_vm2, %v986_v61 }
 0x1ef   : > { %2537 = vmatmul.mubr.msk.bf16.gmra.mxu0 %vm1003_vm2, %v987_v62 }
 0x277   : > { %v2510_v63 = vpop.f32.mrf.mxu0 }
 0x278   : > { %v1095_v4 = vadd.f32 %v2510_v63, %v3249_v1 }
 0x279   : > { %v1086_v0 = vpop.f32.mrf.mxu0 }
 0x27a   : > { %v1087_v3 = vadd.f32 %v3249_v1, %v1086_v0  ;;  %v1215_v11 = vmax.f32 %v1095_v4, 0.0 }
 0x27b   : > { %v2511_v2 = vpop.f32.mrf.mxu0 }
 0x27c   : > { %v1098_v44 = vadd.f32 %v2511_v2, %v3249_v1  ;;  %v1213_v9 = vmax.f32 %v1087_v3, 0.0 }
 0x27d   : > { %v1089_v5 = vpop.f32.mrf.mxu0 }
 0x27e   : > { %v1090_v6 = vadd.f32 %v3249_v1, %v1089_v5  ;;  %v1216_v7 = vmax.f32 %v1098_v44, 0.0 }
 0x27f   : > { %v2514_v8 = vpop.f32.mrf.mxu0 }
 0x280   : > { %v1214_v10 = vmax.f32 %v1090_v6, 0.0  ;;  %v1246_v14 = vpack.c.bf16 %v1216_v7, %v1215_v11  ;;  %v1111_v18 = vadd.f32 %v2514_v8, %v3249_v1 }
 0x281   : > { %v1102_v12 = vpop.f32.mrf.mxu0 }
 0x282   : > { %v1245_v13 = vpack.c.bf16 %v1214_v10, %v1213_v9  ;;  %v1103_v16 = vadd.f32 %v3249_v1, %v1102_v12  ;;  %v1219_v25 = vmax.f32 %v1111_v18, 0.0 }
 0x283   : > { %v2515_v15 = vpop.f32.mrf.mxu0 }
 0x284   : > { %v1114_v17 = vadd.f32 %v2515_v15, %v3249_v1  ;;  %2548 = vmatprep.mubr.msk.bf16.mxu1 %vm762_vm1, %v1245_v13  ;;  %v1217_v23 = vmax.f32 %v1103_v16, 0.0 }
 0x285   : > { %v1105_v19 = vpop.f32.mrf.mxu0  ;;  %2549 = vmatmul.mubr.msk.bf16.vlgmr.msra.gmra.mxu1 %vm762_vm1, %v1246_v14 }
 0x286   : > { %v1106_v20 = vadd.f32 %v3249_v1, %v1105_v19  ;;  %v1220_v21 = vmax.f32 %v1114_v17, 0.0 }
 0x287   : > { %v2518_v22 = vpop.f32.mrf.mxu0 }
 0x288   : > { %v1218_v24 = vmax.f32 %v1106_v20, 0.0  ;;  %v1248_v28 = vpack.c.bf16 %v1220_v21, %v1219_v25  ;;  %v1127_v32 = vadd.f32 %v2518_v22, %v3249_v1 }
 0x289   : > { %v1118_v26 = vpop.f32.mrf.mxu0 }
 0x28a   : > { %v1247_v27 = vpack.c.bf16 %v1218_v24, %v1217_v23  ;;  %v1119_v30 = vadd.f32 %v3249_v1, %v1118_v26  ;;  %v1223_v39 = vmax.f32 %v1127_v32, 0.0 }
 0x28b   : > { %v2519_v29 = vpop.f32.mrf.mxu0 }
 0x28c   : > { %v1130_v31 = vadd.f32 %v2519_v29, %v3249_v1  ;;  %2552 = vmatprep.mubr.msk.bf16.mxu1 %vm762_vm1, %v1247_v27  ;;  %v1221_v37 = vmax.f32 %v1119_v30, 0.0 }
 0x28d   : > { %v1121_v33 = vpop.f32.mrf.mxu0  ;;  %2553 = vmatmul.mubr.msk.bf16.gmra.mxu1 %vm762_vm1, %v1248_v28 }
 0x28e   : > { %v1122_v34 = vadd.f32 %v3249_v1, %v1121_v33  ;;  %v1224_v35 = vmax.f32 %v1130_v31, 0.0 }
 0x28f   : > { %v2522_v36 = vpop.f32.mrf.mxu0 }
 0x290   : > { %v1222_v38 = vmax.f32 %v1122_v34, 0.0  ;;  %v1250_v42 = vpack.c.bf16 %v1224_v35, %v1223_v39  ;;  %v1143_v46 = vadd.f32 %v2522_v36, %v3249_v1 }
 0x291   : > { %v1134_v40 = vpop.f32.mrf.mxu0 }
 0x292   : > { %v1249_v41 = vpack.c.bf16 %v1222_v38, %v1221_v37  ;;  %v1135_v43 = vadd.f32 %v3249_v1, %v1134_v40  ;;  %v1227_v53 = vmax.f32 %v1143_v46, 0.0 }
 0x293   : > { %v2523_v57 = vpop.f32.mrf.mxu0 }
 0x294   : > { %v1146_v45 = vadd.f32 %v2523_v57, %v3249_v1  ;;  %2556 = vmatprep.mubr.msk.bf16.mxu1 %vm762_vm1, %v1249_v41  ;;  %v1225_v51 = vmax.f32 %v1135_v43, 0.0 }
 0x295   : > { %v1137_v47 = vpop.f32.mrf.mxu0  ;;  %2557 = vmatmul.mubr.msk.bf16.gmra.mxu1 %vm762_vm1, %v1250_v42 }
 0x296   : > { %v1138_v48 = vadd.f32 %v3249_v1, %v1137_v47  ;;  %v1228_v49 = vmax.f32 %v1146_v45, 0.0 }
 0x297   : > { %v2526_v50 = vpop.f32.mrf.mxu0 }
 0x298   : > { %v1226_v52 = vmax.f32 %v1138_v48, 0.0  ;;  %v1252_v56 = vpack.c.bf16 %v1228_v49, %v1227_v53  ;;  %v1159_v61 = vadd.f32 %v2526_v50, %v3249_v1  ;;  %v3302_v48 = vld [vmem:[%s3679_s8] ss:$0 sm:$0xff] }
 0x299   : > { %v1150_v54 = vpop.f32.mrf.mxu0 }
 0x29a   : > { %v1251_v55 = vpack.c.bf16 %v1226_v52, %v1225_v51  ;;  %v1151_v59 = vadd.f32 %v3249_v1, %v1150_v54  ;;  %v1231_v4 = vmax.f32 %v1159_v61, 0.0 }
 0x29b   : > { %v2527_v58 = vpop.f32.mrf.mxu0 }
 0x29c   : > { %v1162_v60 = vadd.f32 %v2527_v58, %v3249_v1  ;;  %2560 = vmatprep.mubr.msk.bf16.mxu1 %vm762_vm1, %v1251_v55  ;;  %v1229_v3 = vmax.f32 %v1151_v59, 0.0 }
 0x29d   : > { %v1153_v62 = vpop.f32.mrf.mxu0  ;;  %2561 = vmatmul.mubr.msk.bf16.gmra.mxu1 %vm762_vm1, %v1252_v56 }
 0x29e   : > { %v1154_v63 = vadd.f32 %v3249_v1, %v1153_v62  ;;  %v1232_v0 = vmax.f32 %v1162_v60, 0.0 }
 0x29f   : > { %v2530_v2 = vpop.f32.mrf.mxu0 }
 0x2a0   : > { %v1230_v44 = vmax.f32 %v1154_v63, 0.0  ;;  %v1254_v7 = vpack.c.bf16 %v1232_v0, %v1231_v4  ;;  %v1175_v11 = vadd.f32 %v2530_v2, %v3249_v1 }
 0x2a1   : > { %v1166_v5 = vpop.f32.mrf.mxu0 }
 0x2a2   : > { %v1253_v6 = vpack.c.bf16 %v1230_v44, %v1229_v3  ;;  %v1167_v9 = vadd.f32 %v3249_v1, %v1166_v5  ;;  %v1235_v18 = vmax.f32 %v1175_v11, 0.0 }
 0x2a3   : > { %v2531_v8 = vpop.f32.mrf.mxu0 }
 0x2a4   : > { %v1178_v10 = vadd.f32 %v2531_v8, %v3249_v1  ;;  %2564 = vmatprep.mubr.msk.bf16.mxu1 %vm762_vm1, %v1253_v6  ;;  %v1233_v16 = vmax.f32 %v1167_v9, 0.0 }
 0x2a5   : > { %v1169_v12 = vpop.f32.mrf.mxu0  ;;  %2565 = vmatmul.mubr.msk.bf16.gmra.mxu1 %vm762_vm1, %v1254_v7 }
 0x2a6   : > { %v1170_v13 = vadd.f32 %v3249_v1, %v1169_v12  ;;  %v1236_v14 = vmax.f32 %v1178_v10, 0.0 }
 0x2a7   : > { %v2534_v15 = vpop.f32.mrf.mxu0 }
 0x2a8   : > { %v1234_v17 = vmax.f32 %v1170_v13, 0.0  ;;  %v1256_v21 = vpack.c.bf16 %v1236_v14, %v1235_v18  ;;  %v1191_v25 = vadd.f32 %v2534_v15, %v3249_v1 }
 0x2a9   : > { %v1182_v19 = vpop.f32.mrf.mxu0 }
 0x2aa   : > { %v1255_v20 = vpack.c.bf16 %v1234_v17, %v1233_v16  ;;  %v1183_v23 = vadd.f32 %v3249_v1, %v1182_v19  ;;  %v1239_v32 = vmax.f32 %v1191_v25, 0.0 }
 0x2ab   : > { %v2535_v22 = vpop.f32.mrf.mxu0 }
 0x2ac   : > { %v1194_v24 = vadd.f32 %v2535_v22, %v3249_v1  ;;  %2568 = vmatprep.mubr.msk.bf16.mxu1 %vm762_vm1, %v1255_v20  ;;  %v1237_v30 = vmax.f32 %v1183_v23, 0.0 }
 0x2ad   : > { %v1185_v26 = vpop.f32.mrf.mxu0  ;;  %2569 = vmatmul.mubr.msk.bf16.gmra.mxu1 %vm762_vm1, %v1256_v21 }
 0x2ae   : > { %v1186_v27 = vadd.f32 %v3249_v1, %v1185_v26  ;;  %v1240_v28 = vmax.f32 %v1194_v24, 0.0 }
 0x2af   : > { %v2538_v29 = vpop.f32.mrf.mxu0 }
 0x2b0   : > { %v1238_v31 = vmax.f32 %v1186_v27, 0.0  ;;  %v1258_v35 = vpack.c.bf16 %v1240_v28, %v1239_v32  ;;  %v1207_v39 = vadd.f32 %v2538_v29, %v3249_v1 }
 0x2b1   : > { %v1198_v33 = vpop.f32.mrf.mxu0 }
 0x2b2   : > { %v1257_v34 = vpack.c.bf16 %v1238_v31, %v1237_v30  ;;  %v1199_v37 = vadd.f32 %v3249_v1, %v1198_v33  ;;  %v1243_v45 = vmax.f32 %v1207_v39, 0.0 }
 0x2b3   : > { %v2539_v36 = vpop.f32.mrf.mxu0 }
 0x2b4   : > { %v1210_v38 = vadd.f32 %v2539_v36, %v3249_v1  ;;  %2572 = vmatprep.mubr.msk.bf16.mxu1 %vm762_vm1, %v1257_v34  ;;  %v1241_v57 = vmax.f32 %v1199_v37, 0.0 }
 0x2b5   : > { %v1201_v40 = vpop.f32.mrf.mxu0  ;;  %2573 = vmatmul.mubr.msk.bf16.gmra.mxu1 %vm762_vm1, %v1258_v35 }
 0x2b6   : > { %v1202_v41 = vadd.f32 %v3249_v1, %v1201_v40  ;;  %v1244_v42 = vmax.f32 %v1210_v38, 0.0 }
 0x2b8   : > { %v1242_v43 = vmax.f32 %v1202_v41, 0.0  ;;  %v1260_v47 = vpack.c.bf16 %v1244_v42, %v1243_v45 }
 0x2ba   : > { %v1259_v46 = vpack.c.bf16 %v1242_v43, %v1241_v57 }
 0x2bc   : > { %2576 = vmatprep.mubr.msk.bf16.mxu1 %vm762_vm1, %v1259_v46 }
 0x2bd   : > { %2577 = vmatmul.mubr.msk.bf16.gmra.mxu1 %vm762_vm1, %v1260_v47 }
 0x345   : > { %v2550_v49 = vpop.f32.mrf.mxu1 }
 0x346   : > { %v1391_v50 = vadd.f32 %v2550_v49, %v3302_v48 }
 0x347   : > { %v1382_v51 = vpop.f32.mrf.mxu1 }
 0x348   : > { %1543 = vst.msk [vmem:[%s3306_s18 + $0x10] sm:$0xff] %vm465_vm0, %v1391_v50  ;;  %v1383_v1 = vadd.f32 %v3302_v48, %v1382_v51 }
 0x349   : > { %v2551_v52 = vpop.f32.mrf.mxu1 }
 0x34a   : > { %1541 = vst.msk [vmem:[%s3306_s18] sm:$0xff] %vm465_vm0, %v1383_v1  ;;  %v1394_v53 = vadd.f32 %v2551_v52, %v3302_v48 }
 0x34b   : > { %v1385_v54 = vpop.f32.mrf.mxu1 }
 0x34c   : > { %1544 = vst.msk [vmem:[%s3306_s18 + $0x18] sm:$0xff] %vm465_vm0, %v1394_v53  ;;  %v1386_v55 = vadd.f32 %v3302_v48, %v1385_v54 }
 0x34d   : > { %v2554_v56 = vpop.f32.mrf.mxu1 }
 0x34e   : > { %1542 = vst.msk [vmem:[%s3306_s18 + $0x8] sm:$0xff] %vm465_vm0, %v1386_v55  ;;  %v1407_v58 = vadd.f32 %v2554_v56, %v3302_v48 }
 0x34f   : > { %v1398_v59 = vpop.f32.mrf.mxu1 }
 0x350   : > { %1547 = vst.msk [vmem:[%s3306_s18 + $0x30] sm:$0xff] %vm465_vm0, %v1407_v58  ;;  %v1399_v60 = vadd.f32 %v3302_v48, %v1398_v59 }
 0x351   : > { %v2555_v61 = vpop.f32.mrf.mxu1 }
 0x352   : > { %1545 = vst.msk [vmem:[%s3306_s18 + $0x20] sm:$0xff] %vm465_vm0, %v1399_v60  ;;  %v1410_v62 = vadd.f32 %v2555_v61, %v3302_v48 }
 0x353   : > { %v1401_v63 = vpop.f32.mrf.mxu1 }
 0x354   : > { %1548 = vst.msk [vmem:[%s3306_s18 + $0x38] sm:$0xff] %vm465_vm0, %v1410_v62  ;;  %v1402_v0 = vadd.f32 %v3302_v48, %v1401_v63 }
 0x355   : > { %v2558_v2 = vpop.f32.mrf.mxu1 }
 0x356   : > { %1546 = vst.msk [vmem:[%s3306_s18 + $0x28] sm:$0xff] %vm465_vm0, %v1402_v0  ;;  %v1423_v3 = vadd.f32 %v2558_v2, %v3302_v48 }
 0x357   : > { %v1414_v44 = vpop.f32.mrf.mxu1 }
 0x358   : > { %1551 = vst.msk [vmem:[%s3306_s18 + $0x50] sm:$0xff] %vm465_vm0, %v1423_v3  ;;  %v1415_v4 = vadd.f32 %v3302_v48, %v1414_v44 }
 0x359   : > { %v2559_v5 = vpop.f32.mrf.mxu1 }
 0x35a   : > { %1549 = vst.msk [vmem:[%s3306_s18 + $0x40] sm:$0xff] %vm465_vm0, %v1415_v4  ;;  %v1426_v6 = vadd.f32 %v2559_v5, %v3302_v48 }
 0x35b   : > { %v1417_v7 = vpop.f32.mrf.mxu1 }
 0x35c   : > { %1552 = vst.msk [vmem:[%s3306_s18 + $0x58] sm:$0xff] %vm465_vm0, %v1426_v6  ;;  %v1418_v8 = vadd.f32 %v3302_v48, %v1417_v7 }
 0x35d   : > { %v2562_v9 = vpop.f32.mrf.mxu1 }
 0x35e   : > { %1550 = vst.msk [vmem:[%s3306_s18 + $0x48] sm:$0xff] %vm465_vm0, %v1418_v8  ;;  %v1439_v10 = vadd.f32 %v2562_v9, %v3302_v48 }
 0x35f   : > { %v1430_v11 = vpop.f32.mrf.mxu1 }
 0x360   : > { %1555 = vst.msk [vmem:[%s3306_s18 + $0x70] sm:$0xff] %vm465_vm0, %v1439_v10  ;;  %v1431_v12 = vadd.f32 %v3302_v48, %v1430_v11 }
 0x361   : > { %v2563_v13 = vpop.f32.mrf.mxu1 }
 0x362   : > { %1553 = vst.msk [vmem:[%s3306_s18 + $0x60] sm:$0xff] %vm465_vm0, %v1431_v12  ;;  %v1442_v14 = vadd.f32 %v2563_v13, %v3302_v48 }
 0x363   : > { %v1433_v15 = vpop.f32.mrf.mxu1 }
 0x364   : > { %1556 = vst.msk [vmem:[%s3306_s18 + $0x78] sm:$0xff] %vm465_vm0, %v1442_v14  ;;  %v1434_v16 = vadd.f32 %v3302_v48, %v1433_v15 }
 0x365   : > { %v2566_v17 = vpop.f32.mrf.mxu1 }
 0x366   : > { %1554 = vst.msk [vmem:[%s3306_s18 + $0x68] sm:$0xff] %vm465_vm0, %v1434_v16  ;;  %v1455_v18 = vadd.f32 %v2566_v17, %v3302_v48 }
 0x367   : > { %v1446_v19 = vpop.f32.mrf.mxu1 }
 0x368   : > { %1559 = vst.msk [vmem:[%s3306_s18 + $0x90] sm:$0xff] %vm465_vm0, %v1455_v18  ;;  %v1447_v20 = vadd.f32 %v3302_v48, %v1446_v19 }
 0x369   : > { %v2567_v21 = vpop.f32.mrf.mxu1 }
 0x36a   : > { %1557 = vst.msk [vmem:[%s3306_s18 + $0x80] sm:$0xff] %vm465_vm0, %v1447_v20  ;;  %v1458_v22 = vadd.f32 %v2567_v21, %v3302_v48 }
 0x36b   : > { %v1449_v23 = vpop.f32.mrf.mxu1 }
 0x36c   : > { %1560 = vst.msk [vmem:[%s3306_s18 + $0x98] sm:$0xff] %vm465_vm0, %v1458_v22  ;;  %v1450_v24 = vadd.f32 %v3302_v48, %v1449_v23 }
 0x36d   : > { %v2570_v25 = vpop.f32.mrf.mxu1 }
 0x36e   : > { %1558 = vst.msk [vmem:[%s3306_s18 + $0x88] sm:$0xff] %vm465_vm0, %v1450_v24  ;;  %v1471_v26 = vadd.f32 %v2570_v25, %v3302_v48 }
 0x36f   : > { %v1462_v27 = vpop.f32.mrf.mxu1 }
 0x370   : > { %1563 = vst.msk [vmem:[%s3306_s18 + $0xb0] sm:$0xff] %vm465_vm0, %v1471_v26  ;;  %v1463_v28 = vadd.f32 %v3302_v48, %v1462_v27 }
 0x371   : > { %v2571_v29 = vpop.f32.mrf.mxu1 }
 0x372   : > { %1561 = vst.msk [vmem:[%s3306_s18 + $0xa0] sm:$0xff] %vm465_vm0, %v1463_v28  ;;  %v1474_v30 = vadd.f32 %v2571_v29, %v3302_v48 }
 0x373   : > { %v1465_v31 = vpop.f32.mrf.mxu1 }
 0x374   : > { %1564 = vst.msk [vmem:[%s3306_s18 + $0xb8] sm:$0xff] %vm465_vm0, %v1474_v30  ;;  %v1466_v32 = vadd.f32 %v3302_v48, %v1465_v31 }
 0x375   : > { %v2574_v33 = vpop.f32.mrf.mxu1 }
 0x376   : > { %1562 = vst.msk [vmem:[%s3306_s18 + $0xa8] sm:$0xff] %vm465_vm0, %v1466_v32  ;;  %v1487_v34 = vadd.f32 %v2574_v33, %v3302_v48 }
 0x377   : > { %v1478_v35 = vpop.f32.mrf.mxu1 }
 0x378   : > { %1567 = vst.msk [vmem:[%s3306_s18 + $0xd0] sm:$0xff] %vm465_vm0, %v1487_v34  ;;  %v1479_v36 = vadd.f32 %v3302_v48, %v1478_v35 }
 0x379   : > { %v2575_v37 = vpop.f32.mrf.mxu1 }
 0x37a   : > { %1565 = vst.msk [vmem:[%s3306_s18 + $0xc0] sm:$0xff] %vm465_vm0, %v1479_v36  ;;  %v1490_v38 = vadd.f32 %v2575_v37, %v3302_v48 }
 0x37b   : > { %v1481_v39 = vpop.f32.mrf.mxu1 }
 0x37c   : > { %1568 = vst.msk [vmem:[%s3306_s18 + $0xd8] sm:$0xff] %vm465_vm0, %v1490_v38  ;;  %v1482_v40 = vadd.f32 %v3302_v48, %v1481_v39 }
 0x37d   : > { %v2578_v41 = vpop.f32.mrf.mxu1 }
 0x37e   : > { %1566 = vst.msk [vmem:[%s3306_s18 + $0xc8] sm:$0xff] %vm465_vm0, %v1482_v40  ;;  %v1503_v42 = vadd.f32 %v2578_v41, %v3302_v48 }
 0x37f   : > { %v1494_v57 = vpop.f32.mrf.mxu1 }
 0x380   : > { %1571 = vst.msk [vmem:[%s3306_s18 + $0xf0] sm:$0xff] %vm465_vm0, %v1503_v42  ;;  %v1495_v43 = vadd.f32 %v3302_v48, %v1494_v57 }
 0x381   : > { %v2579_v45 = vpop.f32.mrf.mxu1 }
 0x382   : > { %1569 = vst.msk [vmem:[%s3306_s18 + $0xe0] sm:$0xff] %vm465_vm0, %v1495_v43  ;;  %v1506_v46 = vadd.f32 %v2579_v45, %v3302_v48  ;;  %1583 = sbr.rel (!%p2975_p4) target bundleno = 951 (0x3b7), region = 60 }
 0x383   : > { %v1497_v47 = vpop.f32.mrf.mxu1 }
 0x384   : > { %1572 = vst.msk [vmem:[%s3306_s18 + $0xf8] sm:$0xff] %vm465_vm0, %v1506_v46  ;;  %v1498_v49 = vadd.f32 %v3302_v48, %v1497_v47 }
 0x386   : > { %1570 = vst.msk [vmem:[%s3306_s18 + $0xe8] sm:$0xff] %vm465_vm0, %v1498_v49 }
 0x387   : > { %s3703_s19 = smov (!%p1586_p8, %s1585_s19), 32 }
 0x388   : > { %s2320_s27 = sshll.u32 %s3703_s19, 7 }
 0x389   : > { %p2323_p9 = scmp.eq.s32.totalorder %s2320_s27, 0 }
 0x38a   : > { %s3416_s28 = sshrl.u32 (!%p2323_p9), %s3703_s19, 5 }
 0x38b   : > { %1594 = sbr.rel (%p2323_p9) target bundleno = 951 (0x3b7), region = 64  ;;  %p2324_p10 = scmp.le.s32.totalorder (!%p2323_p9), %s3416_s28, 0 }
 0x390   : > { %2149 = sbr.rel (%p2324_p10) target bundleno = 934 (0x3a6), region = 212  ;;  %s3689_s29 = smov (!%p2324_p10), %s3410_s26 }
 0x391   : > { %s3690_s13 = smov (!%p2324_p10), %s3133_s30  ;;  %s3425_s11 = smov (!%p2324_p10), 0  }
 0x392   : > { %s3427_s12 = smov (!%p2324_p10), 0  }
 0x395 LB: >> { %v1719_v48 = vld [vmem:[%s2837_s13] sm:$0xff]  ;;  %v1721_v50 = vld [vmem:[%s2837_s13 + $0x8] sm:$0xff]  ;;  %v1723_v51 = vld [vmem:[%s2837_s13 + $0x10] sm:$0xff]  ;;  %s1783_s15 = sadd.s32 1, %s2841_s11  ;;  %s1713_s12 = sadd.s32 1, %s2845_s12   ;;  %s2845_s12 = sphi %s3427_s12, %s1713_s12   ;;  %s2841_s11 = sphi %s3425_s11, %s3693_s11   ;;  %s2837_s13 = sphi %s3690_s13, %s3692_s13   ;;  %s2833_s29 = sphi %s3689_s29, %s3691_s29  }
 0x396   : >> { %1720 = vst [vmem:[%s2833_s29] sm:$0xff] %v1719_v48  ;;  %1722 = vst [vmem:[%s2833_s29 + $0x8] sm:$0xff] %v1721_v50  ;;  %v1725_v1 = vld [vmem:[%s2837_s13 + $0x18] sm:$0xff]  ;;  %v1727_v52 = vld [vmem:[%s2837_s13 + $0x20] sm:$0xff]  ;;  %p1784_p11 = scmp.ge.s32.totalorder %s1783_s15, %s3416_s28  ;;  %p1712_p12 = scmp.ge.s32.totalorder %s1713_s12, %s3416_s28 }
 0x397   : >> { %1724 = vst [vmem:[%s2833_s29 + $0x10] sm:$0xff] %v1723_v51  ;;  %v1729_v53 = vld [vmem:[%s2837_s13 + $0x28] sm:$0xff]  ;;  %1726 = vst [vmem:[%s2833_s29 + $0x18] sm:$0xff] %v1725_v1  ;;  %v1731_v54 = vld [vmem:[%s2837_s13 + $0x30] sm:$0xff] }
 0x398   : >> { %1728 = vst [vmem:[%s2833_s29 + $0x20] sm:$0xff] %v1727_v52  ;;  %1730 = vst [vmem:[%s2833_s29 + $0x28] sm:$0xff] %v1729_v53  ;;  %v1733_v55 = vld [vmem:[%s2837_s13 + $0x38] sm:$0xff]  ;;  %v1735_v56 = vld [vmem:[%s2837_s13 + $0x40] sm:$0xff]  ;;  %s3705_s15 = smov (%p1784_p11, %s1783_s15), 0 }
 0x399   : >> { %1732 = vst [vmem:[%s2833_s29 + $0x30] sm:$0xff] %v1731_v54  ;;  %1734 = vst [vmem:[%s2833_s29 + $0x38] sm:$0xff] %v1733_v55  ;;  %v1737_v58 = vld [vmem:[%s2837_s13 + $0x48] sm:$0xff]  ;;  %v1739_v59 = vld [vmem:[%s2837_s13 + $0x50] sm:$0xff]  ;;  %s2325_s22 = sshll.u32 %s3705_s15, 8  ;;  %s3693_s11 = smov %s3705_s15 }
 0x39a   : >> { %1736 = vst [vmem:[%s2833_s29 + $0x40] sm:$0xff] %v1735_v56  ;;  %v1741_v60 = vld [vmem:[%s2837_s13 + $0x58] sm:$0xff]  ;;  %1738 = vst [vmem:[%s2833_s29 + $0x48] sm:$0xff] %v1737_v58  ;;  %v1743_v61 = vld [vmem:[%s2837_s13 + $0x60] sm:$0xff]  ;;  %s3483_s23 = scalar_lea.vmem %s3133_s30, %s2325_s22 [#allocation2]   ;;  %s1789_s25 = scalar_lea.vmem %s3410_s26, %s2325_s22  }
 0x39b   : >> { %1740 = vst [vmem:[%s2833_s29 + $0x50] sm:$0xff] %v1739_v59  ;;  %1742 = vst [vmem:[%s2833_s29 + $0x58] sm:$0xff] %v1741_v60  ;;  %v1745_v62 = vld [vmem:[%s2837_s13 + $0x68] sm:$0xff]  ;;  %v1747_v63 = vld [vmem:[%s2837_s13 + $0x70] sm:$0xff] }
 0x39c   : >> { %1744 = vst [vmem:[%s2833_s29 + $0x60] sm:$0xff] %v1743_v61  ;;  %1746 = vst [vmem:[%s2833_s29 + $0x68] sm:$0xff] %v1745_v62  ;;  %v1749_v0 = vld [vmem:[%s2837_s13 + $0x78] sm:$0xff]  ;;  %v1751_v2 = vld [vmem:[%s2837_s13 + $0x80] sm:$0xff] }
 0x39d   : >> { %1748 = vst [vmem:[%s2833_s29 + $0x70] sm:$0xff] %v1747_v63  ;;  %v1753_v3 = vld [vmem:[%s2837_s13 + $0x88] sm:$0xff]  ;;  %1750 = vst [vmem:[%s2833_s29 + $0x78] sm:$0xff] %v1749_v0  ;;  %v1755_v44 = vld [vmem:[%s2837_s13 + $0x90] sm:$0xff] }
 0x39e   : >> { %1752 = vst [vmem:[%s2833_s29 + $0x80] sm:$0xff] %v1751_v2  ;;  %1754 = vst [vmem:[%s2833_s29 + $0x88] sm:$0xff] %v1753_v3  ;;  %v1757_v4 = vld [vmem:[%s2837_s13 + $0x98] sm:$0xff]  ;;  %v1759_v5 = vld [vmem:[%s2837_s13 + $0xa0] sm:$0xff] }
 0x39f   : >> { %1756 = vst [vmem:[%s2833_s29 + $0x90] sm:$0xff] %v1755_v44  ;;  %1758 = vst [vmem:[%s2833_s29 + $0x98] sm:$0xff] %v1757_v4  ;;  %v1761_v6 = vld [vmem:[%s2837_s13 + $0xa8] sm:$0xff]  ;;  %v1763_v7 = vld [vmem:[%s2837_s13 + $0xb0] sm:$0xff] }
 0x3a0   : >> { %1760 = vst [vmem:[%s2833_s29 + $0xa0] sm:$0xff] %v1759_v5  ;;  %v1765_v8 = vld [vmem:[%s2837_s13 + $0xb8] sm:$0xff]  ;;  %1762 = vst [vmem:[%s2833_s29 + $0xa8] sm:$0xff] %v1761_v6  ;;  %v1767_v9 = vld [vmem:[%s2837_s13 + $0xc0] sm:$0xff] }
 0x3a1   : >> { %1764 = vst [vmem:[%s2833_s29 + $0xb0] sm:$0xff] %v1763_v7  ;;  %1766 = vst [vmem:[%s2833_s29 + $0xb8] sm:$0xff] %v1765_v8  ;;  %v1769_v10 = vld [vmem:[%s2837_s13 + $0xc8] sm:$0xff]  ;;  %v1771_v11 = vld [vmem:[%s2837_s13 + $0xd0] sm:$0xff]  ;;  %1715 = sbr.rel (!%p1712_p12) target bundleno = 917 (0x395), region = 218 }
 0x3a2   : >> { %1768 = vst [vmem:[%s2833_s29 + $0xc0] sm:$0xff] %v1767_v9  ;;  %1770 = vst [vmem:[%s2833_s29 + $0xc8] sm:$0xff] %v1769_v10  ;;  %v1773_v12 = vld [vmem:[%s2837_s13 + $0xd8] sm:$0xff]  ;;  %v1775_v13 = vld [vmem:[%s2837_s13 + $0xe0] sm:$0xff] }
 0x3a3   : >> { %1772 = vst [vmem:[%s2833_s29 + $0xd0] sm:$0xff] %v1771_v11  ;;  %v1777_v14 = vld [vmem:[%s2837_s13 + $0xe8] sm:$0xff]  ;;  %1774 = vst [vmem:[%s2833_s29 + $0xd8] sm:$0xff] %v1773_v12  ;;  %v1779_v15 = vld [vmem:[%s2837_s13 + $0xf0] sm:$0xff] }
 0x3a4   : >> { %1776 = vst [vmem:[%s2833_s29 + $0xe0] sm:$0xff] %v1775_v13  ;;  %1778 = vst [vmem:[%s2833_s29 + $0xe8] sm:$0xff] %v1777_v14  ;;  %v1781_v16 = vld [vmem:[%s2837_s13 + $0xf8] sm:$0xff]  ;;  %s3692_s13 = smov %s3483_s23 }
 0x3a5   : >> { %1780 = vst [vmem:[%s2833_s29 + $0xf0] sm:$0xff] %v1779_v15  ;;  %1782 = vst [vmem:[%s2833_s29 + $0xf8] sm:$0xff] %v1781_v16  ;;  %s3691_s29 = smov %s1789_s25 }
 0x3a6 PF: > { %s3524_s27 = sand.u32 31, %s3703_s19   ;;  %s2350_s22 = sshll.u32 %s3416_s28, 8 }
 0x3a7   : > { %s1794_s0 = scalar_lea.vmem %s3133_s30, %s2350_s22 [#allocation2]   ;;  %s1796_s1 = scalar_lea.vmem %s3410_s26, %s2350_s22  }
 0x3a8   : > { %p2330_p13 = scmp.le.s32.totalorder %s3524_s27, 0 }
 0x3a9   : > { %s2847_s25 = smov (!%p2330_p13), %s1796_s1   ;;  %s2851_s23 = smov (!%p2330_p13), %s1794_s0  }
 0x3aa   : > { %2163 = sbr.rel (%p2330_p13) target bundleno = 951 (0x3b7), region = 223  ;;  %s2855_s2 = smov (!%p2330_p13), 0  }
 0x3ab   : > { %s2859_s15 = smov (!%p2330_p13), 0  }
 0x3af LB: >> { %v1806_v17 = vld [vmem:[%s2853_s23] sm:$0xff]  ;;  %s1808_s19 = sadd.s32 1, %s2857_s2  ;;  %s1800_s15 = sadd.s32 1, %s2861_s15   ;;  %s2861_s15 = sphi %s2859_s15, %s1800_s15   ;;  %s2857_s2 = sphi %s2855_s2, %s2856_s2   ;;  %s2853_s23 = sphi %s2851_s23, %s1813_s23   ;;  %s2849_s25 = sphi %s2847_s25, %s1814_s25  }
 0x3b0   : >> { %1807 = vst [vmem:[%s2849_s25] sm:$0xff] %v1806_v17  ;;  %p1809_p0 = scmp.ge.s32.totalorder %s1808_s19, %s3524_s27  ;;  %p1799_p1 = scmp.ge.s32.totalorder %s1800_s15, %s3524_s27 }
 0x3b2   : >> { %s3707_s19 = smov (%p1809_p0, %s1808_s19), 0  ;;  %1802 = sbr.rel (!%p1799_p1) target bundleno = 943 (0x3af), region = 229 }
 0x3b3   : >> { %s2331_s30 = sshll.u32 %s3707_s19, 3  ;;  %s2856_s2 = smov %s3707_s19  }
 0x3b4   : >> { %s1813_s23 = scalar_lea.vmem %s1794_s0, %s2331_s30 [#allocation2]   ;;  %s1814_s25 = scalar_lea.vmem %s1796_s1, %s2331_s30  }
 0x3b7 PF: > { %1820 = sbr.rel (!%p2975_p4) target bundleno = 1004 (0x3ec), region = 112  ;;  %s1822_s2 = ssub.s32 (%p2975_p4), 38, %s2983_s24 }
 0x3b8   : > { %s2352_s26 = sshll.u32 (%p2975_p4), %s2963_s16, 8  ;;  %p1823_p2 = scmp.lt.s32.totalorder (%p2975_p4), %s1822_s2, 32 }
 0x3b9   : > { %s3539_s13 = scalar_lea.vmem (%p2975_p4), %s3681_s10, %s2352_s26  }
 0x3bc   : > { %s3709_s2 = smov (!%p1823_p2, %s1822_s2), 32 }
 0x3bd   : > { %s2334_s11 = sshll.u32 %s3709_s2, 7 }
 0x3be   : > { %p2337_p3 = scmp.eq.s32.totalorder %s2334_s11, 0 }
 0x3bf   : > { %s3545_s0 = sshrl.u32 (!%p2337_p3), %s3709_s2, 5 }
 0x3c0   : > { %1831 = sbr.rel (%p2337_p3) target bundleno = 1004 (0x3ec), region = 116  ;;  %p2338_p4 = scmp.le.s32.totalorder (!%p2337_p3), %s3545_s0, 0 }
 0x3c5   : > { %2177 = sbr.rel (%p2338_p4) target bundleno = 987 (0x3db), region = 234  ;;  %s3694_s1 = smov (!%p2338_p4), %s3539_s13 }
 0x3c6   : > { %s3695_s16 = smov (!%p2338_p4), %s3306_s18  ;;  %s3554_s21 = smov (!%p2338_p4), 0  }
 0x3c7   : > { %s3556_s24 = smov (!%p2338_p4), 0  }
 0x3ca LB: >> { %v1956_v18 = vld [vmem:[%s2869_s16] sm:$0xff]  ;;  %v1958_v19 = vld [vmem:[%s2869_s16 + $0x8] sm:$0xff]  ;;  %v1960_v20 = vld [vmem:[%s2869_s16 + $0x10] sm:$0xff]  ;;  %s2020_s12 = sadd.s32 1, %s2873_s21  ;;  %s1950_s24 = sadd.s32 1, %s2877_s24   ;;  %s2877_s24 = sphi %s3556_s24, %s1950_s24   ;;  %s2873_s21 = sphi %s3554_s21, %s3698_s21   ;;  %s2869_s16 = sphi %s3695_s16, %s3697_s16   ;;  %s2865_s1 = sphi %s3694_s1, %s3696_s1  }
 0x3cb   : >> { %1957 = vst [vmem:[%s2865_s1] sm:$0xff] %v1956_v18  ;;  %1959 = vst [vmem:[%s2865_s1 + $0x8] sm:$0xff] %v1958_v19  ;;  %v1962_v21 = vld [vmem:[%s2869_s16 + $0x18] sm:$0xff]  ;;  %v1964_v22 = vld [vmem:[%s2869_s16 + $0x20] sm:$0xff]  ;;  %p2021_p5 = scmp.ge.s32.totalorder %s2020_s12, %s3545_s0  ;;  %p1949_p6 = scmp.ge.s32.totalorder %s1950_s24, %s3545_s0 }
 0x3cc   : >> { %1961 = vst [vmem:[%s2865_s1 + $0x10] sm:$0xff] %v1960_v20  ;;  %v1966_v23 = vld [vmem:[%s2869_s16 + $0x28] sm:$0xff]  ;;  %1963 = vst [vmem:[%s2865_s1 + $0x18] sm:$0xff] %v1962_v21  ;;  %v1968_v24 = vld [vmem:[%s2869_s16 + $0x30] sm:$0xff] }
 0x3cd   : >> { %1965 = vst [vmem:[%s2865_s1 + $0x20] sm:$0xff] %v1964_v22  ;;  %1967 = vst [vmem:[%s2865_s1 + $0x28] sm:$0xff] %v1966_v23  ;;  %v1970_v25 = vld [vmem:[%s2869_s16 + $0x38] sm:$0xff]  ;;  %v1972_v26 = vld [vmem:[%s2869_s16 + $0x40] sm:$0xff]  ;;  %s3711_s12 = smov (%p2021_p5, %s2020_s12), 0 }
 0x3ce   : >> { %1969 = vst [vmem:[%s2865_s1 + $0x30] sm:$0xff] %v1968_v24  ;;  %1971 = vst [vmem:[%s2865_s1 + $0x38] sm:$0xff] %v1970_v25  ;;  %v1974_v27 = vld [vmem:[%s2869_s16 + $0x48] sm:$0xff]  ;;  %v1976_v28 = vld [vmem:[%s2869_s16 + $0x50] sm:$0xff]  ;;  %s2339_s27 = sshll.u32 %s3711_s12, 8  ;;  %s3698_s21 = smov %s3711_s12 }
 0x3cf   : >> { %1973 = vst [vmem:[%s2865_s1 + $0x40] sm:$0xff] %v1972_v26  ;;  %v1978_v29 = vld [vmem:[%s2869_s16 + $0x58] sm:$0xff]  ;;  %1975 = vst [vmem:[%s2865_s1 + $0x48] sm:$0xff] %v1974_v27  ;;  %v1980_v30 = vld [vmem:[%s2869_s16 + $0x60] sm:$0xff]  ;;  %s3612_s22 = scalar_lea.vmem %s3306_s18, %s2339_s27 [#allocation3]   ;;  %s2026_s25 = scalar_lea.vmem %s3539_s13, %s2339_s27  }
 0x3d0   : >> { %1977 = vst [vmem:[%s2865_s1 + $0x50] sm:$0xff] %v1976_v28  ;;  %1979 = vst [vmem:[%s2865_s1 + $0x58] sm:$0xff] %v1978_v29  ;;  %v1982_v31 = vld [vmem:[%s2869_s16 + $0x68] sm:$0xff]  ;;  %v1984_v32 = vld [vmem:[%s2869_s16 + $0x70] sm:$0xff] }
 0x3d1   : >> { %1981 = vst [vmem:[%s2865_s1 + $0x60] sm:$0xff] %v1980_v30  ;;  %1983 = vst [vmem:[%s2865_s1 + $0x68] sm:$0xff] %v1982_v31  ;;  %v1986_v33 = vld [vmem:[%s2869_s16 + $0x78] sm:$0xff]  ;;  %v1988_v34 = vld [vmem:[%s2869_s16 + $0x80] sm:$0xff] }
 0x3d2   : >> { %1985 = vst [vmem:[%s2865_s1 + $0x70] sm:$0xff] %v1984_v32  ;;  %v1990_v35 = vld [vmem:[%s2869_s16 + $0x88] sm:$0xff]  ;;  %1987 = vst [vmem:[%s2865_s1 + $0x78] sm:$0xff] %v1986_v33  ;;  %v1992_v36 = vld [vmem:[%s2869_s16 + $0x90] sm:$0xff] }
 0x3d3   : >> { %1989 = vst [vmem:[%s2865_s1 + $0x80] sm:$0xff] %v1988_v34  ;;  %1991 = vst [vmem:[%s2865_s1 + $0x88] sm:$0xff] %v1990_v35  ;;  %v1994_v37 = vld [vmem:[%s2869_s16 + $0x98] sm:$0xff]  ;;  %v1996_v38 = vld [vmem:[%s2869_s16 + $0xa0] sm:$0xff] }
 0x3d4   : >> { %1993 = vst [vmem:[%s2865_s1 + $0x90] sm:$0xff] %v1992_v36  ;;  %1995 = vst [vmem:[%s2865_s1 + $0x98] sm:$0xff] %v1994_v37  ;;  %v1998_v39 = vld [vmem:[%s2869_s16 + $0xa8] sm:$0xff]  ;;  %v2000_v40 = vld [vmem:[%s2869_s16 + $0xb0] sm:$0xff] }
 0x3d5   : >> { %1997 = vst [vmem:[%s2865_s1 + $0xa0] sm:$0xff] %v1996_v38  ;;  %v2002_v41 = vld [vmem:[%s2869_s16 + $0xb8] sm:$0xff]  ;;  %1999 = vst [vmem:[%s2865_s1 + $0xa8] sm:$0xff] %v1998_v39  ;;  %v2004_v42 = vld [vmem:[%s2869_s16 + $0xc0] sm:$0xff] }
 0x3d6   : >> { %2001 = vst [vmem:[%s2865_s1 + $0xb0] sm:$0xff] %v2000_v40  ;;  %2003 = vst [vmem:[%s2865_s1 + $0xb8] sm:$0xff] %v2002_v41  ;;  %v2006_v57 = vld [vmem:[%s2869_s16 + $0xc8] sm:$0xff]  ;;  %v2008_v43 = vld [vmem:[%s2869_s16 + $0xd0] sm:$0xff]  ;;  %1952 = sbr.rel (!%p1949_p6) target bundleno = 970 (0x3ca), region = 240 }
 0x3d7   : >> { %2005 = vst [vmem:[%s2865_s1 + $0xc0] sm:$0xff] %v2004_v42  ;;  %2007 = vst [vmem:[%s2865_s1 + $0xc8] sm:$0xff] %v2006_v57  ;;  %v2010_v45 = vld [vmem:[%s2869_s16 + $0xd8] sm:$0xff]  ;;  %v2012_v46 = vld [vmem:[%s2869_s16 + $0xe0] sm:$0xff] }
 0x3d8   : >> { %2009 = vst [vmem:[%s2865_s1 + $0xd0] sm:$0xff] %v2008_v43  ;;  %v2014_v47 = vld [vmem:[%s2869_s16 + $0xe8] sm:$0xff]  ;;  %2011 = vst [vmem:[%s2865_s1 + $0xd8] sm:$0xff] %v2010_v45  ;;  %v2016_v49 = vld [vmem:[%s2869_s16 + $0xf0] sm:$0xff] }
 0x3d9   : >> { %2013 = vst [vmem:[%s2865_s1 + $0xe0] sm:$0xff] %v2012_v46  ;;  %2015 = vst [vmem:[%s2865_s1 + $0xe8] sm:$0xff] %v2014_v47  ;;  %v2018_v48 = vld [vmem:[%s2869_s16 + $0xf8] sm:$0xff]  ;;  %s3697_s16 = smov %s3612_s22 }
 0x3da   : >> { %2017 = vst [vmem:[%s2865_s1 + $0xf0] sm:$0xff] %v2016_v49  ;;  %2019 = vst [vmem:[%s2865_s1 + $0xf8] sm:$0xff] %v2018_v48  ;;  %s3696_s1 = smov %s2026_s25 }
 0x3db PF: > { %s3653_s23 = sand.u32 31, %s3709_s2   ;;  %s2353_s15 = sshll.u32 %s3545_s0, 8 }
 0x3dc   : > { %s2031_s19 = scalar_lea.vmem %s3306_s18, %s2353_s15 [#allocation3]   ;;  %s2033_s30 = scalar_lea.vmem %s3539_s13, %s2353_s15  }
 0x3dd   : > { %p2344_p7 = scmp.le.s32.totalorder %s3653_s23, 0 }
 0x3de   : > { %s2879_s26 = smov (!%p2344_p7), %s2033_s30   ;;  %s2883_s28 = smov (!%p2344_p7), %s2031_s19  }
 0x3df   : > { %2191 = sbr.rel (%p2344_p7) target bundleno = 1004 (0x3ec), region = 245  ;;  %s2887_s29 = smov (!%p2344_p7), 0  }
 0x3e0   : > { %s2891_s11 = smov (!%p2344_p7), 0  }
 0x3e4 LB: >> { %v2043_v50 = vld [vmem:[%s2885_s28] sm:$0xff]  ;;  %s2045_s2 = sadd.s32 1, %s2889_s29  ;;  %s2037_s11 = sadd.s32 1, %s2893_s11   ;;  %s2893_s11 = sphi %s2891_s11, %s2037_s11   ;;  %s2889_s29 = sphi %s2887_s29, %s2888_s29   ;;  %s2885_s28 = sphi %s2883_s28, %s2050_s28   ;;  %s2881_s26 = sphi %s2879_s26, %s2051_s26  }
 0x3e5   : >> { %2044 = vst [vmem:[%s2881_s26] sm:$0xff] %v2043_v50  ;;  %p2046_p8 = scmp.ge.s32.totalorder %s2045_s2, %s3653_s23  ;;  %p2036_p9 = scmp.ge.s32.totalorder %s2037_s11, %s3653_s23 }
 0x3e7   : >> { %s3713_s2 = smov (%p2046_p8, %s2045_s2), 0  ;;  %2039 = sbr.rel (!%p2036_p9) target bundleno = 996 (0x3e4), region = 251 }
 0x3e8   : >> { %s2345_s18 = sshll.u32 %s3713_s2, 3  ;;  %s2888_s29 = smov %s3713_s2  }
 0x3e9   : >> { %s2050_s28 = scalar_lea.vmem %s2031_s19, %s2345_s18 [#allocation3]   ;;  %s2051_s26 = scalar_lea.vmem %s2033_s30, %s2345_s18  }
 0x3ec PF: > { %p18_p10 = scmp.ge.s32.totalorder %s2965_s17, 4   ;;  %s3699_s13 = smov %s2825_s14 }
 0x3ed   : > { %s3700_s14 = smov %s2973_s20  ;;  %s3701_s15 = smov %s2965_s17 }
 0x3ee   :  { %20 = sbr.rel (!%p18_p10) target bundleno = 6 (0x6), region = 262 }

</bundles_post_ra>
